<compile_context>
chip_gen: v5e
topology: v5e:2x2
jax: 0.10.0
libtpu: 0.0.40
codegen_flags: <defaults>
</compile_context>

<pallas_src>
import functools
import math

import jax
import jax.numpy as jnp
import numpy as np
from jax.experimental import pallas as pl
from jax.experimental.pallas import tpu as pltpu


# ----------------------------------------------------------------------------
# Pallas kernel
# ----------------------------------------------------------------------------
def _rab_kernel(x_ref,
                wq_ref, bq_ref, wk_ref, bk_ref, wv_ref, bv_ref,
                wo_ref, bo_ref,
                g1_ref, be1_ref, g2_ref, be2_ref,
                wfc_ref, bfc_ref, wpr_ref, bpr_ref,
                o_ref, *, d_model, n_head, seq_len, b_tile, eps):
    D, H, L = d_model, n_head, seq_len
    hd = D // H
    cdt = wq_ref.dtype                       # MXU input dtype (bf16 by default)

    # Flatten the (b_tile, L, D) block to (b_tile*L, D) rows for the big
    # matmuls (pure leading-index slices + sublane concat; no reshapes).
    if b_tile == 1:
        x = x_ref[0].astype(jnp.float32)
    else:
        x = jnp.concatenate([x_ref[b] for b in range(b_tile)],
                            axis=0).astype(jnp.float32)          # (M, D) fp32

    def layer_norm(v, g_ref, b_ref):                              # fp32 LN
        mu = jnp.mean(v, axis=-1, keepdims=True)
        var = jnp.mean((v - mu) ** 2, axis=-1, keepdims=True)
        return (v - mu) * jax.lax.rsqrt(var + eps) * g_ref[...] + b_ref[...]

    # ---- LayerNorm 1 + QKV projections (scale folded into wq/bq) ----------
    h1 = layer_norm(x, g1_ref, be1_ref).astype(cdt)
    q = (jnp.dot(h1, wq_ref[...], preferred_element_type=jnp.float32)
         + bq_ref[...]).astype(cdt)
    k = (jnp.dot(h1, wk_ref[...], preferred_element_type=jnp.float32)
         + bk_ref[...]).astype(cdt)
    v = (jnp.dot(h1, wv_ref[...], preferred_element_type=jnp.float32)
         + bv_ref[...]).astype(cdt)

    def split_heads(t, r0):                  # rows r0:r0+L -> (H, L, hd)
        return jnp.stack(
            [t[r0:r0 + L, h * hd:(h + 1) * hd] for h in range(H)], axis=0)

    # ---- head-batched self-attention (one batch element at a time) --------
    # TODO(synk): attn_mask is None in this CLIP block; an additive mask would
    # simply be added to `s` below.
    outs = []
    for b in range(b_tile):
        r0 = b * L
        qh = split_heads(q, r0)              # (H, L, hd)
        kh = split_heads(k, r0)
        vh = split_heads(v, r0)
        s = jnp.einsum('hqd,hkd->hqk', qh, kh,
                       preferred_element_type=jnp.float32)       # (H, L, L)
        s = s - jnp.max(s, axis=-1, keepdims=True)
        p = jnp.exp(s)
        p = p * pl.reciprocal(jnp.sum(p, axis=-1, keepdims=True), approx=True)
        ob = jnp.einsum('hqk,hkd->hqd', p.astype(cdt), vh,
                        preferred_element_type=jnp.float32)      # (H, L, hd)
        # Fused head-merge + output projection: sum_h o_h @ Wo[h]
        zb = jnp.einsum('hqd,hde->hqe', ob.astype(cdt), wo_ref[...],
                        preferred_element_type=jnp.float32)      # (H, L, D)
        outs.append(jnp.sum(zb, axis=0))                         # (L, D)
    attn = outs[0] if b_tile == 1 else jnp.concatenate(outs, axis=0)
    x = x + attn + bo_ref[...]                                   # residual 1

    # ---- LayerNorm 2 + MLP (QuickGELU) -------------------------------------
    h2 = layer_norm(x, g2_ref, be2_ref).astype(cdt)
    f = (jnp.dot(h2, wfc_ref[...], preferred_element_type=jnp.float32)
         + bfc_ref[...])
    f = f * jax.nn.sigmoid(1.702 * f)                            # QuickGELU
    m = (jnp.dot(f.astype(cdt), wpr_ref[...],
                 preferred_element_type=jnp.float32) + bpr_ref[...])
    x = x + m                                                    # residual 2

    for b in range(b_tile):
        o_ref[b] = x[b * L:(b + 1) * L, :].astype(o_ref.dtype)


# ----------------------------------------------------------------------------
# Wrapper
# ----------------------------------------------------------------------------
def _pick_batch_tile(n, seq_len, target_rows=256, max_tile=8):
    """Largest divisor of n (<= max_tile) with bt*seq_len <= ~target_rows."""
    best = 1
    for bt in range(1, min(n, max_tile) + 1):
        if n % bt == 0 and bt * seq_len <= max(target_rows, seq_len):
            best = bt
    return best


def residual_attention_block(x, params, n_head, compute_dtype=jnp.bfloat16):
    """x: (L, N, D) float array; params: PyTorch-convention weights."""
    L, N, D = x.shape
    hd = D // n_head
    scale = 1.0 / math.sqrt(hd)
    f32 = jnp.float32
    cdt = compute_dtype

    xt = jnp.transpose(x, (1, 0, 2))                 # (N, L, D)

    # Split packed in_proj into Wq/Wk/Wv, pre-transpose, fold softmax scale.
    w_in = params["in_proj_weight"].astype(f32)      # (3D, D)
    b_in = params["in_proj_bias"].astype(f32)        # (3D,)
    wq = (w_in[0:D].T * scale).astype(cdt)           # (D, D), scale folded
    wk = w_in[D:2 * D].T.astype(cdt)
    wv = w_in[2 * D:3 * D].T.astype(cdt)
    bq = (b_in[0:D] * scale).reshape(1, D)
    bk = b_in[D:2 * D].reshape(1, D)
    bv = b_in[2 * D:3 * D].reshape(1, D)

    # Output projection reshaped head-major so head-merge + proj fuse.
    wo3 = params["out_proj_weight"].T.reshape(n_head, hd, D).astype(cdt)
    bo = params["out_proj_bias"].reshape(1, D).astype(f32)

    g1 = params["ln1_weight"].reshape(1, D).astype(f32)
    be1 = params["ln1_bias"].reshape(1, D).astype(f32)
    g2 = params["ln2_weight"].reshape(1, D).astype(f32)
    be2 = params["ln2_bias"].reshape(1, D).astype(f32)

    wfc = params["c_fc_weight"].T.astype(cdt)        # (D, 4D)
    bfc = params["c_fc_bias"].reshape(1, 4 * D).astype(f32)
    wpr = params["c_proj_weight"].T.astype(cdt)      # (4D, D)
    bpr = params["c_proj_bias"].reshape(1, D).astype(f32)

    consts = [wq, bq, wk, bk, wv, bv, wo3, bo,
              g1, be1, g2, be2, wfc, bfc, wpr, bpr]

    bt = _pick_batch_tile(N, L)

    def full(a):
        # Grid-invariant operand: constant index_map keeps it resident.
        # TODO(synk): on v7x (64 MiB VMEM) at CLIP scale these could also be
        # single-buffered via pipeline_mode=pl.Buffered(1).
        return pl.BlockSpec(a.shape, lambda n, nd=a.ndim: (0,) * nd)

    kernel = functools.partial(_rab_kernel, d_model=D, n_head=n_head,
                               seq_len=L, b_tile=bt, eps=1e-5)

    out = pl.pallas_call(
        kernel,
        out_shape=jax.ShapeDtypeStruct((N, L, D), x.dtype),
        grid_spec=pltpu.PrefetchScalarGridSpec(
            num_scalar_prefetch=0,
            grid=(N // bt,),
            in_specs=[pl.BlockSpec((bt, L, D), lambda n: (n, 0, 0))]
                     + [full(a) for a in consts],
            out_specs=pl.BlockSpec((bt, L, D), lambda n: (n, 0, 0)),
        ),
        compiler_params=pltpu.CompilerParams(
            dimension_semantics=("parallel",),
            # v5e's default scoped VMEM limit is only 16 MiB; 64 MiB leaves
            # room for resident bf16 weights + double-buffered activation
            # blocks while staying within v7x's 64 MiB physical VMEM.
            vmem_limit_bytes=64 * 1024 * 1024,
        ),
    )(xt, *consts)

    return jnp.transpose(out, (1, 0, 2))             # back to (L, N, D)


# ----------------------------------------------------------------------------
# Pure-JAX reference (mirrors the PyTorch forward) for validation
# ----------------------------------------------------------------------------
def reference_block(x, p, n_head):
    L, N, D = x.shape
    hd = D // n_head
    eps = 1e-5

    def ln(v, g, b):
        v = v.astype(jnp.float32)
        mu = jnp.mean(v, axis=-1, keepdims=True)
        var = jnp.mean((v - mu) ** 2, axis=-1, keepdims=True)
        return (v - mu) / jnp.sqrt(var + eps) * g + b

    h1 = ln(x, p["ln1_weight"], p["ln1_bias"])              # (L, N, D)
    qkv = jnp.einsum("lnd,ed->lne", h1, p["in_proj_weight"]) + p["in_proj_bias"]
    q, k, v = jnp.split(qkv, 3, axis=-1)
    q = q.reshape(L, N, n_head, hd) / math.sqrt(hd)
    k = k.reshape(L, N, n_head, hd)
    v = v.reshape(L, N, n_head, hd)
    s = jnp.einsum("qnhd,knhd->nhqk", q, k)
    pw = jax.nn.softmax(s, axis=-1)
    o = jnp.einsum("nhqk,knhd->qnhd", pw, v).reshape(L, N, D)
    attn = jnp.einsum("lnd,ed->lne", o, p["out_proj_weight"]) + p["out_proj_bias"]
    x = x + attn

    h2 = ln(x, p["ln2_weight"], p["ln2_bias"])
    f = jnp.einsum("lnd,fd->lnf", h2, p["c_fc_weight"]) + p["c_fc_bias"]
    f = f * jax.nn.sigmoid(1.702 * f)
    m = jnp.einsum("lnf,df->lnd", f, p["c_proj_weight"]) + p["c_proj_bias"]
    return x + m


# ----------------------------------------------------------------------------
# Main
# ----------------------------------------------------------------------------
if __name__ == "__main__":
    L, N, D, H = 8, 2, 32, 4

    keys = jax.random.split(jax.random.PRNGKey(0), 13)
    params = {
        # nn.MultiheadAttention packed projections (PyTorch: y = x W^T + b)
        "in_proj_weight": 0.05 * jax.random.normal(keys[0], (3 * D, D), jnp.float32),
        "in_proj_bias":   0.05 * jax.random.normal(keys[1], (3 * D,), jnp.float32),
        "out_proj_weight": 0.05 * jax.random.normal(keys[2], (D, D), jnp.float32),
        "out_proj_bias":   0.05 * jax.random.normal(keys[3], (D,), jnp.float32),
        "ln1_weight": 1.0 + 0.1 * jax.random.normal(keys[4], (D,), jnp.float32),
        "ln1_bias":         0.1 * jax.random.normal(keys[5], (D,), jnp.float32),
        "ln2_weight": 1.0 + 0.1 * jax.random.normal(keys[6], (D,), jnp.float32),
        "ln2_bias":         0.1 * jax.random.normal(keys[7], (D,), jnp.float32),
        "c_fc_weight":   0.05 * jax.random.normal(keys[8], (4 * D, D), jnp.float32),
        "c_fc_bias":     0.05 * jax.random.normal(keys[9], (4 * D,), jnp.float32),
        "c_proj_weight": 0.05 * jax.random.normal(keys[10], (D, 4 * D), jnp.float32),
        "c_proj_bias":   0.05 * jax.random.normal(keys[11], (D,), jnp.float32),
    }
    x = jax.random.normal(keys[12], (L, N, D), jnp.float32)

    ref = jax.block_until_ready(reference_block(x, params, H))

    # Production config: bf16 MXU operands, fp32 accumulation / LN / softmax.
    out_bf16 = jax.block_until_ready(residual_attention_block(x, params, H))
    np.testing.assert_allclose(np.asarray(out_bf16), np.asarray(ref),
                               rtol=2e-2, atol=2e-2)

    # Full-fp32 config: tighter structural check.
    out_f32 = jax.block_until_ready(
        residual_attention_block(x, params, H, compute_dtype=jnp.float32))
    np.testing.assert_allclose(np.asarray(out_f32), np.asarray(ref),
                               rtol=5e-3, atol=5e-3)

    print("KERNEL_OK")
</pallas_src>

<mosaic_0001>
module attributes {stable_mosaic.version = 11 : i64} {
  func.func @_rab_kernel(%arg0: i32, %arg1: memref<2x8x32xf32, #tpu.memory_space<vmem>>, %arg2: memref<32x32xbf16, #tpu.memory_space<vmem>>, %arg3: memref<1x32xf32, #tpu.memory_space<vmem>>, %arg4: memref<32x32xbf16, #tpu.memory_space<vmem>>, %arg5: memref<1x32xf32, #tpu.memory_space<vmem>>, %arg6: memref<32x32xbf16, #tpu.memory_space<vmem>>, %arg7: memref<1x32xf32, #tpu.memory_space<vmem>>, %arg8: memref<4x8x32xbf16, #tpu.memory_space<vmem>>, %arg9: memref<1x32xf32, #tpu.memory_space<vmem>>, %arg10: memref<1x32xf32, #tpu.memory_space<vmem>>, %arg11: memref<1x32xf32, #tpu.memory_space<vmem>>, %arg12: memref<1x32xf32, #tpu.memory_space<vmem>>, %arg13: memref<1x32xf32, #tpu.memory_space<vmem>>, %arg14: memref<32x128xbf16, #tpu.memory_space<vmem>>, %arg15: memref<1x128xf32, #tpu.memory_space<vmem>>, %arg16: memref<128x32xbf16, #tpu.memory_space<vmem>>, %arg17: memref<1x32xf32, #tpu.memory_space<vmem>>, %arg18: memref<2x8x32xf32, #tpu.memory_space<vmem>>) attributes {dimension_semantics = [#tpu.dimension_semantics<parallel>], iteration_bounds = array<i64: 1>, scalar_prefetch = 0 : i64, scratch_operands = 0 : i64, tpu.core_type = #tpu.core_type<tc>, window_params = [{transform_indices = @transform_0, window_bounds = array<i64: 2, 8, 32>}, {pipeline_mode = #tpu.pipeline_mode<synchronous>, transform_indices = @transform_1, window_bounds = array<i64: 32, 32>}, {pipeline_mode = #tpu.pipeline_mode<synchronous>, transform_indices = @transform_2, window_bounds = array<i64: 1, 32>}, {pipeline_mode = #tpu.pipeline_mode<synchronous>, transform_indices = @transform_3, window_bounds = array<i64: 32, 32>}, {pipeline_mode = #tpu.pipeline_mode<synchronous>, transform_indices = @transform_4, window_bounds = array<i64: 1, 32>}, {pipeline_mode = #tpu.pipeline_mode<synchronous>, transform_indices = @transform_5, window_bounds = array<i64: 32, 32>}, {pipeline_mode = #tpu.pipeline_mode<synchronous>, transform_indices = @transform_6, window_bounds = array<i64: 1, 32>}, {pipeline_mode = #tpu.pipeline_mode<synchronous>, transform_indices = @transform_7, window_bounds = array<i64: 4, 8, 32>}, {pipeline_mode = #tpu.pipeline_mode<synchronous>, transform_indices = @transform_8, window_bounds = array<i64: 1, 32>}, {pipeline_mode = #tpu.pipeline_mode<synchronous>, transform_indices = @transform_9, window_bounds = array<i64: 1, 32>}, {pipeline_mode = #tpu.pipeline_mode<synchronous>, transform_indices = @transform_10, window_bounds = array<i64: 1, 32>}, {pipeline_mode = #tpu.pipeline_mode<synchronous>, transform_indices = @transform_11, window_bounds = array<i64: 1, 32>}, {pipeline_mode = #tpu.pipeline_mode<synchronous>, transform_indices = @transform_12, window_bounds = array<i64: 1, 32>}, {pipeline_mode = #tpu.pipeline_mode<synchronous>, transform_indices = @transform_13, window_bounds = array<i64: 32, 128>}, {pipeline_mode = #tpu.pipeline_mode<synchronous>, transform_indices = @transform_14, window_bounds = array<i64: 1, 128>}, {pipeline_mode = #tpu.pipeline_mode<synchronous>, transform_indices = @transform_15, window_bounds = array<i64: 128, 32>}, {pipeline_mode = #tpu.pipeline_mode<synchronous>, transform_indices = @transform_16, window_bounds = array<i64: 1, 32>}, {transform_indices = @transform_17, window_bounds = array<i64: 2, 8, 32>}]} {
    %c0 = arith.constant 0 : index
    %c0_0 = arith.constant 0 : index
    %c0_1 = arith.constant 0 : index
    %0 = vector.load %arg1[%c0, %c0_0, %c0_1] : memref<2x8x32xf32, #tpu.memory_space<vmem>>, vector<1x8x32xf32>
    %1 = vector.shape_cast %0 : vector<1x8x32xf32> to vector<8x32xf32>
    %c1 = arith.constant 1 : index
    %c0_2 = arith.constant 0 : index
    %c0_3 = arith.constant 0 : index
    %2 = vector.load %arg1[%c1, %c0_2, %c0_3] : memref<2x8x32xf32, #tpu.memory_space<vmem>>, vector<1x8x32xf32>
    %3 = vector.shape_cast %2 : vector<1x8x32xf32> to vector<8x32xf32>
    %4 = tpu.concatenate %1, %3 in 0 : vector<8x32xf32>, vector<8x32xf32> -> vector<16x32xf32>
    %cst = arith.constant dense<0.000000e+00> : vector<16xf32>
    %5 = vector.multi_reduction <add>, %4, %cst [1] : vector<16x32xf32> to vector<16xf32>
    %6 = vector.shape_cast %5 : vector<16xf32> to vector<16x1xf32>
    %cst_4 = arith.constant 3.200000e+01 : f32
    %7 = vector.broadcast %cst_4 : f32 to vector<16x1xf32>
    %8 = arith.divf %6, %7 : vector<16x1xf32>
    %9 = vector.broadcast %8 : vector<16x1xf32> to vector<16x32xf32>
    %10 = arith.subf %4, %9 : vector<16x32xf32>
    %11 = arith.mulf %10, %10 : vector<16x32xf32>
    %cst_5 = arith.constant dense<0.000000e+00> : vector<16xf32>
    %12 = vector.multi_reduction <add>, %11, %cst_5 [1] : vector<16x32xf32> to vector<16xf32>
    %13 = vector.shape_cast %12 : vector<16xf32> to vector<16x1xf32>
    %cst_6 = arith.constant 3.200000e+01 : f32
    %14 = vector.broadcast %cst_6 : f32 to vector<16x1xf32>
    %15 = arith.divf %13, %14 : vector<16x1xf32>
    %16 = vector.broadcast %8 : vector<16x1xf32> to vector<16x32xf32>
    %17 = arith.subf %4, %16 : vector<16x32xf32>
    %cst_7 = arith.constant 9.99999974E-6 : f32
    %18 = vector.broadcast %cst_7 : f32 to vector<16x1xf32>
    %19 = arith.addf %15, %18 : vector<16x1xf32>
    %20 = math.rsqrt %19 : vector<16x1xf32>
    %21 = vector.broadcast %20 : vector<16x1xf32> to vector<16x32xf32>
    %22 = arith.mulf %17, %21 : vector<16x32xf32>
    %c0_8 = arith.constant 0 : index
    %c0_9 = arith.constant 0 : index
    %23 = vector.load %arg10[%c0_8, %c0_9] : memref<1x32xf32, #tpu.memory_space<vmem>>, vector<1x32xf32>
    %24 = vector.broadcast %23 : vector<1x32xf32> to vector<16x32xf32>
    %25 = arith.mulf %22, %24 : vector<16x32xf32>
    %c0_10 = arith.constant 0 : index
    %c0_11 = arith.constant 0 : index
    %26 = vector.load %arg11[%c0_10, %c0_11] : memref<1x32xf32, #tpu.memory_space<vmem>>, vector<1x32xf32>
    %27 = vector.broadcast %26 : vector<1x32xf32> to vector<16x32xf32>
    %28 = arith.addf %25, %27 : vector<16x32xf32>
    %29 = arith.truncf %28 : vector<16x32xf32> to vector<16x32xbf16>
    %c0_12 = arith.constant 0 : index
    %c0_13 = arith.constant 0 : index
    %30 = vector.load %arg2[%c0_12, %c0_13] : memref<32x32xbf16, #tpu.memory_space<vmem>>, vector<32x32xbf16>
    %cst_14 = arith.constant dense<0.000000e+00> : vector<16x32xf32>
    %31 = tpu.matmul %29, %30, %cst_14 {dimension_numbers = #tpu.dot_dimension_numbers<[1], [0], [0], [1], [0, 0, 1, 1], [], []>} : vector<16x32xbf16>, vector<32x32xbf16>, vector<16x32xf32> -> vector<16x32xf32>
    %c0_15 = arith.constant 0 : index
    %c0_16 = arith.constant 0 : index
    %32 = vector.load %arg3[%c0_15, %c0_16] : memref<1x32xf32, #tpu.memory_space<vmem>>, vector<1x32xf32>
    %33 = vector.broadcast %32 : vector<1x32xf32> to vector<16x32xf32>
    %34 = arith.addf %31, %33 : vector<16x32xf32>
    %35 = arith.truncf %34 : vector<16x32xf32> to vector<16x32xbf16>
    %c0_17 = arith.constant 0 : index
    %c0_18 = arith.constant 0 : index
    %36 = vector.load %arg4[%c0_17, %c0_18] : memref<32x32xbf16, #tpu.memory_space<vmem>>, vector<32x32xbf16>
    %cst_19 = arith.constant dense<0.000000e+00> : vector<16x32xf32>
    %37 = tpu.matmul %29, %36, %cst_19 {dimension_numbers = #tpu.dot_dimension_numbers<[1], [0], [0], [1], [0, 0, 1, 1], [], []>} : vector<16x32xbf16>, vector<32x32xbf16>, vector<16x32xf32> -> vector<16x32xf32>
    %c0_20 = arith.constant 0 : index
    %c0_21 = arith.constant 0 : index
    %38 = vector.load %arg5[%c0_20, %c0_21] : memref<1x32xf32, #tpu.memory_space<vmem>>, vector<1x32xf32>
    %39 = vector.broadcast %38 : vector<1x32xf32> to vector<16x32xf32>
    %40 = arith.addf %37, %39 : vector<16x32xf32>
    %41 = arith.truncf %40 : vector<16x32xf32> to vector<16x32xbf16>
    %c0_22 = arith.constant 0 : index
    %c0_23 = arith.constant 0 : index
    %42 = vector.load %arg6[%c0_22, %c0_23] : memref<32x32xbf16, #tpu.memory_space<vmem>>, vector<32x32xbf16>
    %cst_24 = arith.constant dense<0.000000e+00> : vector<16x32xf32>
    %43 = tpu.matmul %29, %42, %cst_24 {dimension_numbers = #tpu.dot_dimension_numbers<[1], [0], [0], [1], [0, 0, 1, 1], [], []>} : vector<16x32xbf16>, vector<32x32xbf16>, vector<16x32xf32> -> vector<16x32xf32>
    %c0_25 = arith.constant 0 : index
    %c0_26 = arith.constant 0 : index
    %44 = vector.load %arg7[%c0_25, %c0_26] : memref<1x32xf32, #tpu.memory_space<vmem>>, vector<1x32xf32>
    %45 = vector.broadcast %44 : vector<1x32xf32> to vector<16x32xf32>
    %46 = arith.addf %43, %45 : vector<16x32xf32>
    %47 = arith.truncf %46 : vector<16x32xf32> to vector<16x32xbf16>
    %48 = vector.extract_strided_slice %35 {offsets = [0, 0], sizes = [8, 8], strides = [1, 1]} : vector<16x32xbf16> to vector<8x8xbf16>
    %49 = vector.extract_strided_slice %35 {offsets = [0, 8], sizes = [8, 8], strides = [1, 1]} : vector<16x32xbf16> to vector<8x8xbf16>
    %50 = vector.extract_strided_slice %35 {offsets = [0, 16], sizes = [8, 8], strides = [1, 1]} : vector<16x32xbf16> to vector<8x8xbf16>
    %51 = vector.extract_strided_slice %35 {offsets = [0, 24], sizes = [8, 8], strides = [1, 1]} : vector<16x32xbf16> to vector<8x8xbf16>
    %52 = vector.shape_cast %48 : vector<8x8xbf16> to vector<1x8x8xbf16>
    %53 = vector.shape_cast %49 : vector<8x8xbf16> to vector<1x8x8xbf16>
    %54 = vector.shape_cast %50 : vector<8x8xbf16> to vector<1x8x8xbf16>
    %55 = vector.shape_cast %51 : vector<8x8xbf16> to vector<1x8x8xbf16>
    %56 = tpu.concatenate %52, %53, %54, %55 in 0 : vector<1x8x8xbf16>, vector<1x8x8xbf16>, vector<1x8x8xbf16>, vector<1x8x8xbf16> -> vector<4x8x8xbf16>
    %57 = vector.extract_strided_slice %41 {offsets = [0, 0], sizes = [8, 8], strides = [1, 1]} : vector<16x32xbf16> to vector<8x8xbf16>
    %58 = vector.extract_strided_slice %41 {offsets = [0, 8], sizes = [8, 8], strides = [1, 1]} : vector<16x32xbf16> to vector<8x8xbf16>
    %59 = vector.extract_strided_slice %41 {offsets = [0, 16], sizes = [8, 8], strides = [1, 1]} : vector<16x32xbf16> to vector<8x8xbf16>
    %60 = vector.extract_strided_slice %41 {offsets = [0, 24], sizes = [8, 8], strides = [1, 1]} : vector<16x32xbf16> to vector<8x8xbf16>
    %61 = vector.shape_cast %57 : vector<8x8xbf16> to vector<1x8x8xbf16>
    %62 = vector.shape_cast %58 : vector<8x8xbf16> to vector<1x8x8xbf16>
    %63 = vector.shape_cast %59 : vector<8x8xbf16> to vector<1x8x8xbf16>
    %64 = vector.shape_cast %60 : vector<8x8xbf16> to vector<1x8x8xbf16>
    %65 = tpu.concatenate %61, %62, %63, %64 in 0 : vector<1x8x8xbf16>, vector<1x8x8xbf16>, vector<1x8x8xbf16>, vector<1x8x8xbf16> -> vector<4x8x8xbf16>
    %66 = vector.extract_strided_slice %47 {offsets = [0, 0], sizes = [8, 8], strides = [1, 1]} : vector<16x32xbf16> to vector<8x8xbf16>
    %67 = vector.extract_strided_slice %47 {offsets = [0, 8], sizes = [8, 8], strides = [1, 1]} : vector<16x32xbf16> to vector<8x8xbf16>
    %68 = vector.extract_strided_slice %47 {offsets = [0, 16], sizes = [8, 8], strides = [1, 1]} : vector<16x32xbf16> to vector<8x8xbf16>
    %69 = vector.extract_strided_slice %47 {offsets = [0, 24], sizes = [8, 8], strides = [1, 1]} : vector<16x32xbf16> to vector<8x8xbf16>
    %70 = vector.shape_cast %66 : vector<8x8xbf16> to vector<1x8x8xbf16>
    %71 = vector.shape_cast %67 : vector<8x8xbf16> to vector<1x8x8xbf16>
    %72 = vector.shape_cast %68 : vector<8x8xbf16> to vector<1x8x8xbf16>
    %73 = vector.shape_cast %69 : vector<8x8xbf16> to vector<1x8x8xbf16>
    %74 = tpu.concatenate %70, %71, %72, %73 in 0 : vector<1x8x8xbf16>, vector<1x8x8xbf16>, vector<1x8x8xbf16>, vector<1x8x8xbf16> -> vector<4x8x8xbf16>
    "tpu.trace_start"() <{level = 10 : i32, message = "hqd,hkd->hqk"}> : () -> ()
    %cst_27 = arith.constant dense<0.000000e+00> : vector<4x8x8xf32>
    %75 = tpu.matmul %56, %65, %cst_27 {dimension_numbers = #tpu.dot_dimension_numbers<[2], [2], [1], [1], [0, 0, 0, 1, 1, 1], [0], [0]>} : vector<4x8x8xbf16>, vector<4x8x8xbf16>, vector<4x8x8xf32> -> vector<4x8x8xf32>
    "tpu.trace_stop"() : () -> ()
    %cst_28 = arith.constant dense<0xFF800000> : vector<4x8xf32>
    %76 = vector.multi_reduction <maximumf>, %75, %cst_28 [2] : vector<4x8x8xf32> to vector<4x8xf32>
    %77 = vector.shape_cast %76 : vector<4x8xf32> to vector<4x8x1xf32>
    %78 = vector.broadcast %77 : vector<4x8x1xf32> to vector<4x8x8xf32>
    %79 = arith.subf %75, %78 : vector<4x8x8xf32>
    %80 = math.exp %79 : vector<4x8x8xf32>
    %cst_29 = arith.constant dense<0.000000e+00> : vector<4x8xf32>
    %81 = vector.multi_reduction <add>, %80, %cst_29 [2] : vector<4x8x8xf32> to vector<4x8xf32>
    %82 = vector.shape_cast %81 : vector<4x8xf32> to vector<4x8x1xf32>
    %83 = tpu.reciprocal %82 {approx = true} : vector<4x8x1xf32> -> vector<4x8x1xf32>
    %84 = vector.broadcast %83 : vector<4x8x1xf32> to vector<4x8x8xf32>
    %85 = arith.mulf %80, %84 : vector<4x8x8xf32>
    %86 = arith.truncf %85 : vector<4x8x8xf32> to vector<4x8x8xbf16>
    "tpu.trace_start"() <{level = 10 : i32, message = "hqk,hkd->hqd"}> : () -> ()
    %cst_30 = arith.constant dense<0.000000e+00> : vector<4x8x8xf32>
    %87 = tpu.matmul %86, %74, %cst_30 {dimension_numbers = #tpu.dot_dimension_numbers<[2], [1], [1], [2], [0, 0, 0, 1, 1, 2], [0], [0]>} : vector<4x8x8xbf16>, vector<4x8x8xbf16>, vector<4x8x8xf32> -> vector<4x8x8xf32>
    "tpu.trace_stop"() : () -> ()
    %88 = arith.truncf %87 : vector<4x8x8xf32> to vector<4x8x8xbf16>
    %c0_31 = arith.constant 0 : index
    %c0_32 = arith.constant 0 : index
    %c0_33 = arith.constant 0 : index
    %89 = vector.load %arg8[%c0_31, %c0_32, %c0_33] : memref<4x8x32xbf16, #tpu.memory_space<vmem>>, vector<4x8x32xbf16>
    "tpu.trace_start"() <{level = 10 : i32, message = "hqd,hde->hqe"}> : () -> ()
    %cst_34 = arith.constant dense<0.000000e+00> : vector<4x8x32xf32>
    %90 = tpu.matmul %88, %89, %cst_34 {dimension_numbers = #tpu.dot_dimension_numbers<[2], [1], [1], [2], [0, 0, 0, 1, 1, 2], [0], [0]>} : vector<4x8x8xbf16>, vector<4x8x32xbf16>, vector<4x8x32xf32> -> vector<4x8x32xf32>
    "tpu.trace_stop"() : () -> ()
    %cst_35 = arith.constant dense<0.000000e+00> : vector<8x32xf32>
    %91 = vector.multi_reduction <add>, %90, %cst_35 [0] : vector<4x8x32xf32> to vector<8x32xf32>
    %92 = vector.extract_strided_slice %35 {offsets = [8, 0], sizes = [8, 8], strides = [1, 1]} : vector<16x32xbf16> to vector<8x8xbf16>
    %93 = vector.extract_strided_slice %35 {offsets = [8, 8], sizes = [8, 8], strides = [1, 1]} : vector<16x32xbf16> to vector<8x8xbf16>
    %94 = vector.extract_strided_slice %35 {offsets = [8, 16], sizes = [8, 8], strides = [1, 1]} : vector<16x32xbf16> to vector<8x8xbf16>
    %95 = vector.extract_strided_slice %35 {offsets = [8, 24], sizes = [8, 8], strides = [1, 1]} : vector<16x32xbf16> to vector<8x8xbf16>
    %96 = vector.shape_cast %92 : vector<8x8xbf16> to vector<1x8x8xbf16>
    %97 = vector.shape_cast %93 : vector<8x8xbf16> to vector<1x8x8xbf16>
    %98 = vector.shape_cast %94 : vector<8x8xbf16> to vector<1x8x8xbf16>
    %99 = vector.shape_cast %95 : vector<8x8xbf16> to vector<1x8x8xbf16>
    %100 = tpu.concatenate %96, %97, %98, %99 in 0 : vector<1x8x8xbf16>, vector<1x8x8xbf16>, vector<1x8x8xbf16>, vector<1x8x8xbf16> -> vector<4x8x8xbf16>
    %101 = vector.extract_strided_slice %41 {offsets = [8, 0], sizes = [8, 8], strides = [1, 1]} : vector<16x32xbf16> to vector<8x8xbf16>
    %102 = vector.extract_strided_slice %41 {offsets = [8, 8], sizes = [8, 8], strides = [1, 1]} : vector<16x32xbf16> to vector<8x8xbf16>
    %103 = vector.extract_strided_slice %41 {offsets = [8, 16], sizes = [8, 8], strides = [1, 1]} : vector<16x32xbf16> to vector<8x8xbf16>
    %104 = vector.extract_strided_slice %41 {offsets = [8, 24], sizes = [8, 8], strides = [1, 1]} : vector<16x32xbf16> to vector<8x8xbf16>
    %105 = vector.shape_cast %101 : vector<8x8xbf16> to vector<1x8x8xbf16>
    %106 = vector.shape_cast %102 : vector<8x8xbf16> to vector<1x8x8xbf16>
    %107 = vector.shape_cast %103 : vector<8x8xbf16> to vector<1x8x8xbf16>
    %108 = vector.shape_cast %104 : vector<8x8xbf16> to vector<1x8x8xbf16>
    %109 = tpu.concatenate %105, %106, %107, %108 in 0 : vector<1x8x8xbf16>, vector<1x8x8xbf16>, vector<1x8x8xbf16>, vector<1x8x8xbf16> -> vector<4x8x8xbf16>
    %110 = vector.extract_strided_slice %47 {offsets = [8, 0], sizes = [8, 8], strides = [1, 1]} : vector<16x32xbf16> to vector<8x8xbf16>
    %111 = vector.extract_strided_slice %47 {offsets = [8, 8], sizes = [8, 8], strides = [1, 1]} : vector<16x32xbf16> to vector<8x8xbf16>
    %112 = vector.extract_strided_slice %47 {offsets = [8, 16], sizes = [8, 8], strides = [1, 1]} : vector<16x32xbf16> to vector<8x8xbf16>
    %113 = vector.extract_strided_slice %47 {offsets = [8, 24], sizes = [8, 8], strides = [1, 1]} : vector<16x32xbf16> to vector<8x8xbf16>
    %114 = vector.shape_cast %110 : vector<8x8xbf16> to vector<1x8x8xbf16>
    %115 = vector.shape_cast %111 : vector<8x8xbf16> to vector<1x8x8xbf16>
    %116 = vector.shape_cast %112 : vector<8x8xbf16> to vector<1x8x8xbf16>
    %117 = vector.shape_cast %113 : vector<8x8xbf16> to vector<1x8x8xbf16>
    %118 = tpu.concatenate %114, %115, %116, %117 in 0 : vector<1x8x8xbf16>, vector<1x8x8xbf16>, vector<1x8x8xbf16>, vector<1x8x8xbf16> -> vector<4x8x8xbf16>
    "tpu.trace_start"() <{level = 10 : i32, message = "hqd,hkd->hqk"}> : () -> ()
    %cst_36 = arith.constant dense<0.000000e+00> : vector<4x8x8xf32>
    %119 = tpu.matmul %100, %109, %cst_36 {dimension_numbers = #tpu.dot_dimension_numbers<[2], [2], [1], [1], [0, 0, 0, 1, 1, 1], [0], [0]>} : vector<4x8x8xbf16>, vector<4x8x8xbf16>, vector<4x8x8xf32> -> vector<4x8x8xf32>
    "tpu.trace_stop"() : () -> ()
    %cst_37 = arith.constant dense<0xFF800000> : vector<4x8xf32>
    %120 = vector.multi_reduction <maximumf>, %119, %cst_37 [2] : vector<4x8x8xf32> to vector<4x8xf32>
    %121 = vector.shape_cast %120 : vector<4x8xf32> to vector<4x8x1xf32>
    %122 = vector.broadcast %121 : vector<4x8x1xf32> to vector<4x8x8xf32>
    %123 = arith.subf %119, %122 : vector<4x8x8xf32>
    %124 = math.exp %123 : vector<4x8x8xf32>
    %cst_38 = arith.constant dense<0.000000e+00> : vector<4x8xf32>
    %125 = vector.multi_reduction <add>, %124, %cst_38 [2] : vector<4x8x8xf32> to vector<4x8xf32>
    %126 = vector.shape_cast %125 : vector<4x8xf32> to vector<4x8x1xf32>
    %127 = tpu.reciprocal %126 {approx = true} : vector<4x8x1xf32> -> vector<4x8x1xf32>
    %128 = vector.broadcast %127 : vector<4x8x1xf32> to vector<4x8x8xf32>
    %129 = arith.mulf %124, %128 : vector<4x8x8xf32>
    %130 = arith.truncf %129 : vector<4x8x8xf32> to vector<4x8x8xbf16>
    "tpu.trace_start"() <{level = 10 : i32, message = "hqk,hkd->hqd"}> : () -> ()
    %cst_39 = arith.constant dense<0.000000e+00> : vector<4x8x8xf32>
    %131 = tpu.matmul %130, %118, %cst_39 {dimension_numbers = #tpu.dot_dimension_numbers<[2], [1], [1], [2], [0, 0, 0, 1, 1, 2], [0], [0]>} : vector<4x8x8xbf16>, vector<4x8x8xbf16>, vector<4x8x8xf32> -> vector<4x8x8xf32>
    "tpu.trace_stop"() : () -> ()
    %132 = arith.truncf %131 : vector<4x8x8xf32> to vector<4x8x8xbf16>
    %c0_40 = arith.constant 0 : index
    %c0_41 = arith.constant 0 : index
    %c0_42 = arith.constant 0 : index
    %133 = vector.load %arg8[%c0_40, %c0_41, %c0_42] : memref<4x8x32xbf16, #tpu.memory_space<vmem>>, vector<4x8x32xbf16>
    "tpu.trace_start"() <{level = 10 : i32, message = "hqd,hde->hqe"}> : () -> ()
    %cst_43 = arith.constant dense<0.000000e+00> : vector<4x8x32xf32>
    %134 = tpu.matmul %132, %133, %cst_43 {dimension_numbers = #tpu.dot_dimension_numbers<[2], [1], [1], [2], [0, 0, 0, 1, 1, 2], [0], [0]>} : vector<4x8x8xbf16>, vector<4x8x32xbf16>, vector<4x8x32xf32> -> vector<4x8x32xf32>
    "tpu.trace_stop"() : () -> ()
    %cst_44 = arith.constant dense<0.000000e+00> : vector<8x32xf32>
    %135 = vector.multi_reduction <add>, %134, %cst_44 [0] : vector<4x8x32xf32> to vector<8x32xf32>
    %136 = tpu.concatenate %91, %135 in 0 : vector<8x32xf32>, vector<8x32xf32> -> vector<16x32xf32>
    %137 = arith.addf %4, %136 : vector<16x32xf32>
    %c0_45 = arith.constant 0 : index
    %c0_46 = arith.constant 0 : index
    %138 = vector.load %arg9[%c0_45, %c0_46] : memref<1x32xf32, #tpu.memory_space<vmem>>, vector<1x32xf32>
    %139 = vector.broadcast %138 : vector<1x32xf32> to vector<16x32xf32>
    %140 = arith.addf %137, %139 : vector<16x32xf32>
    %cst_47 = arith.constant dense<0.000000e+00> : vector<16xf32>
    %141 = vector.multi_reduction <add>, %140, %cst_47 [1] : vector<16x32xf32> to vector<16xf32>
    %142 = vector.shape_cast %141 : vector<16xf32> to vector<16x1xf32>
    %cst_48 = arith.constant 3.200000e+01 : f32
    %143 = vector.broadcast %cst_48 : f32 to vector<16x1xf32>
    %144 = arith.divf %142, %143 : vector<16x1xf32>
    %145 = vector.broadcast %144 : vector<16x1xf32> to vector<16x32xf32>
    %146 = arith.subf %140, %145 : vector<16x32xf32>
    %147 = arith.mulf %146, %146 : vector<16x32xf32>
    %cst_49 = arith.constant dense<0.000000e+00> : vector<16xf32>
    %148 = vector.multi_reduction <add>, %147, %cst_49 [1] : vector<16x32xf32> to vector<16xf32>
    %149 = vector.shape_cast %148 : vector<16xf32> to vector<16x1xf32>
    %cst_50 = arith.constant 3.200000e+01 : f32
    %150 = vector.broadcast %cst_50 : f32 to vector<16x1xf32>
    %151 = arith.divf %149, %150 : vector<16x1xf32>
    %152 = vector.broadcast %144 : vector<16x1xf32> to vector<16x32xf32>
    %153 = arith.subf %140, %152 : vector<16x32xf32>
    %cst_51 = arith.constant 9.99999974E-6 : f32
    %154 = vector.broadcast %cst_51 : f32 to vector<16x1xf32>
    %155 = arith.addf %151, %154 : vector<16x1xf32>
    %156 = math.rsqrt %155 : vector<16x1xf32>
    %157 = vector.broadcast %156 : vector<16x1xf32> to vector<16x32xf32>
    %158 = arith.mulf %153, %157 : vector<16x32xf32>
    %c0_52 = arith.constant 0 : index
    %c0_53 = arith.constant 0 : index
    %159 = vector.load %arg12[%c0_52, %c0_53] : memref<1x32xf32, #tpu.memory_space<vmem>>, vector<1x32xf32>
    %160 = vector.broadcast %159 : vector<1x32xf32> to vector<16x32xf32>
    %161 = arith.mulf %158, %160 : vector<16x32xf32>
    %c0_54 = arith.constant 0 : index
    %c0_55 = arith.constant 0 : index
    %162 = vector.load %arg13[%c0_54, %c0_55] : memref<1x32xf32, #tpu.memory_space<vmem>>, vector<1x32xf32>
    %163 = vector.broadcast %162 : vector<1x32xf32> to vector<16x32xf32>
    %164 = arith.addf %161, %163 : vector<16x32xf32>
    %165 = arith.truncf %164 : vector<16x32xf32> to vector<16x32xbf16>
    %c0_56 = arith.constant 0 : index
    %c0_57 = arith.constant 0 : index
    %166 = vector.load %arg14[%c0_56, %c0_57] : memref<32x128xbf16, #tpu.memory_space<vmem>>, vector<32x128xbf16>
    %cst_58 = arith.constant dense<0.000000e+00> : vector<16x128xf32>
    %167 = tpu.matmul %165, %166, %cst_58 {dimension_numbers = #tpu.dot_dimension_numbers<[1], [0], [0], [1], [0, 0, 1, 1], [], []>} : vector<16x32xbf16>, vector<32x128xbf16>, vector<16x128xf32> -> vector<16x128xf32>
    %c0_59 = arith.constant 0 : index
    %c0_60 = arith.constant 0 : index
    %168 = vector.load %arg15[%c0_59, %c0_60] : memref<1x128xf32, #tpu.memory_space<vmem>>, vector<1x128xf32>
    %169 = vector.broadcast %168 : vector<1x128xf32> to vector<16x128xf32>
    %170 = arith.addf %167, %169 : vector<16x128xf32>
    %cst_61 = arith.constant 1.702000e+00 : f32
    %171 = vector.broadcast %cst_61 : f32 to vector<16x128xf32>
    %172 = arith.mulf %171, %170 : vector<16x128xf32>
    %173 = arith.negf %172 : vector<16x128xf32>
    %174 = math.exp %173 : vector<16x128xf32>
    %cst_62 = arith.constant 1.000000e+00 : f32
    %175 = vector.broadcast %cst_62 : f32 to vector<16x128xf32>
    %176 = arith.addf %175, %174 : vector<16x128xf32>
    %177 = arith.divf %175, %176 : vector<16x128xf32>
    %178 = arith.mulf %170, %177 : vector<16x128xf32>
    %179 = arith.truncf %178 : vector<16x128xf32> to vector<16x128xbf16>
    %c0_63 = arith.constant 0 : index
    %c0_64 = arith.constant 0 : index
    %180 = vector.load %arg16[%c0_63, %c0_64] : memref<128x32xbf16, #tpu.memory_space<vmem>>, vector<128x32xbf16>
    %cst_65 = arith.constant dense<0.000000e+00> : vector<16x32xf32>
    %181 = tpu.matmul %179, %180, %cst_65 {dimension_numbers = #tpu.dot_dimension_numbers<[1], [0], [0], [1], [0, 0, 1, 1], [], []>} : vector<16x128xbf16>, vector<128x32xbf16>, vector<16x32xf32> -> vector<16x32xf32>
    %c0_66 = arith.constant 0 : index
    %c0_67 = arith.constant 0 : index
    %182 = vector.load %arg17[%c0_66, %c0_67] : memref<1x32xf32, #tpu.memory_space<vmem>>, vector<1x32xf32>
    %183 = vector.broadcast %182 : vector<1x32xf32> to vector<16x32xf32>
    %184 = arith.addf %181, %183 : vector<16x32xf32>
    %185 = arith.addf %140, %184 : vector<16x32xf32>
    %186 = vector.extract_strided_slice %185 {offsets = [0, 0], sizes = [8, 32], strides = [1, 1]} : vector<16x32xf32> to vector<8x32xf32>
    %c0_68 = arith.constant 0 : index
    %c0_69 = arith.constant 0 : index
    %c0_70 = arith.constant 0 : index
    %187 = vector.load %arg18[%c0_68, %c0_69, %c0_70] : memref<2x8x32xf32, #tpu.memory_space<vmem>>, vector<1x8x32xf32>
    %188 = vector.shape_cast %187 : vector<1x8x32xf32> to vector<8x32xf32>
    %189 = vector.shape_cast %186 : vector<8x32xf32> to vector<1x8x32xf32>
    tpu.vector_store %arg18[%c0_68, %c0_69, %c0_70], %189 {strides = array<i32>} : memref<2x8x32xf32, #tpu.memory_space<vmem>>, vector<1x8x32xf32>,
    %190 = vector.extract_strided_slice %185 {offsets = [8, 0], sizes = [8, 32], strides = [1, 1]} : vector<16x32xf32> to vector<8x32xf32>
    %c1_71 = arith.constant 1 : index
    %c0_72 = arith.constant 0 : index
    %c0_73 = arith.constant 0 : index
    %191 = vector.load %arg18[%c1_71, %c0_72, %c0_73] : memref<2x8x32xf32, #tpu.memory_space<vmem>>, vector<1x8x32xf32>
    %192 = vector.shape_cast %191 : vector<1x8x32xf32> to vector<8x32xf32>
    %193 = vector.shape_cast %190 : vector<8x32xf32> to vector<1x8x32xf32>
    tpu.vector_store %arg18[%c1_71, %c0_72, %c0_73], %193 {strides = array<i32>} : memref<2x8x32xf32, #tpu.memory_space<vmem>>, vector<1x8x32xf32>,
    return
  }
  func.func @transform_0(%arg0: i32) -> (i32, i32, i32) {
    %c0_i32 = arith.constant 0 : i32
    %c0_i32_0 = arith.constant 0 : i32
    %c0_i32_1 = arith.constant 0 : i32
    return %arg0, %c0_i32, %c0_i32_0 : i32, i32, i32
  }
  func.func @transform_1(%arg0: i32) -> (i32, i32) {
    %c0_i32 = arith.constant 0 : i32
    %c0_i32_0 = arith.constant 0 : i32
    %c0_i32_1 = arith.constant 0 : i32
    return %c0_i32, %c0_i32_0 : i32, i32
  }
  func.func @transform_2(%arg0: i32) -> (i32, i32) {
    %c0_i32 = arith.constant 0 : i32
    %c0_i32_0 = arith.constant 0 : i32
    %c0_i32_1 = arith.constant 0 : i32
    return %c0_i32, %c0_i32_0 : i32, i32
  }
  func.func @transform_3(%arg0: i32) -> (i32, i32) {
    %c0_i32 = arith.constant 0 : i32
    %c0_i32_0 = arith.constant 0 : i32
    %c0_i32_1 = arith.constant 0 : i32
    return %c0_i32, %c0_i32_0 : i32, i32
  }
  func.func @transform_4(%arg0: i32) -> (i32, i32) {
    %c0_i32 = arith.constant 0 : i32
    %c0_i32_0 = arith.constant 0 : i32
    %c0_i32_1 = arith.constant 0 : i32
    return %c0_i32, %c0_i32_0 : i32, i32
  }
  func.func @transform_5(%arg0: i32) -> (i32, i32) {
    %c0_i32 = arith.constant 0 : i32
    %c0_i32_0 = arith.constant 0 : i32
    %c0_i32_1 = arith.constant 0 : i32
    return %c0_i32, %c0_i32_0 : i32, i32
  }
  func.func @transform_6(%arg0: i32) -> (i32, i32) {
    %c0_i32 = arith.constant 0 : i32
    %c0_i32_0 = arith.constant 0 : i32
    %c0_i32_1 = arith.constant 0 : i32
    return %c0_i32, %c0_i32_0 : i32, i32
  }
  func.func @transform_7(%arg0: i32) -> (i32, i32, i32) {
    %c0_i32 = arith.constant 0 : i32
    %c0_i32_0 = arith.constant 0 : i32
    %c0_i32_1 = arith.constant 0 : i32
    %c0_i32_2 = arith.constant 0 : i32
    return %c0_i32, %c0_i32_0, %c0_i32_1 : i32, i32, i32
  }
  func.func @transform_8(%arg0: i32) -> (i32, i32) {
    %c0_i32 = arith.constant 0 : i32
    %c0_i32_0 = arith.constant 0 : i32
    %c0_i32_1 = arith.constant 0 : i32
    return %c0_i32, %c0_i32_0 : i32, i32
  }
  func.func @transform_9(%arg0: i32) -> (i32, i32) {
    %c0_i32 = arith.constant 0 : i32
    %c0_i32_0 = arith.constant 0 : i32
    %c0_i32_1 = arith.constant 0 : i32
    return %c0_i32, %c0_i32_0 : i32, i32
  }
  func.func @transform_10(%arg0: i32) -> (i32, i32) {
    %c0_i32 = arith.constant 0 : i32
    %c0_i32_0 = arith.constant 0 : i32
    %c0_i32_1 = arith.constant 0 : i32
    return %c0_i32, %c0_i32_0 : i32, i32
  }
  func.func @transform_11(%arg0: i32) -> (i32, i32) {
    %c0_i32 = arith.constant 0 : i32
    %c0_i32_0 = arith.constant 0 : i32
    %c0_i32_1 = arith.constant 0 : i32
    return %c0_i32, %c0_i32_0 : i32, i32
  }
  func.func @transform_12(%arg0: i32) -> (i32, i32) {
    %c0_i32 = arith.constant 0 : i32
    %c0_i32_0 = arith.constant 0 : i32
    %c0_i32_1 = arith.constant 0 : i32
    return %c0_i32, %c0_i32_0 : i32, i32
  }
  func.func @transform_13(%arg0: i32) -> (i32, i32) {
    %c0_i32 = arith.constant 0 : i32
    %c0_i32_0 = arith.constant 0 : i32
    %c0_i32_1 = arith.constant 0 : i32
    return %c0_i32, %c0_i32_0 : i32, i32
  }
  func.func @transform_14(%arg0: i32) -> (i32, i32) {
    %c0_i32 = arith.constant 0 : i32
    %c0_i32_0 = arith.constant 0 : i32
    %c0_i32_1 = arith.constant 0 : i32
    return %c0_i32, %c0_i32_0 : i32, i32
  }
  func.func @transform_15(%arg0: i32) -> (i32, i32) {
    %c0_i32 = arith.constant 0 : i32
    %c0_i32_0 = arith.constant 0 : i32
    %c0_i32_1 = arith.constant 0 : i32
    return %c0_i32, %c0_i32_0 : i32, i32
  }
  func.func @transform_16(%arg0: i32) -> (i32, i32) {
    %c0_i32 = arith.constant 0 : i32
    %c0_i32_0 = arith.constant 0 : i32
    %c0_i32_1 = arith.constant 0 : i32
    return %c0_i32, %c0_i32_0 : i32, i32
  }
  func.func @transform_17(%arg0: i32) -> (i32, i32, i32) {
    %c0_i32 = arith.constant 0 : i32
    %c0_i32_0 = arith.constant 0 : i32
    %c0_i32_1 = arith.constant 0 : i32
    return %arg0, %c0_i32, %c0_i32_0 : i32, i32, i32
  }
}

</mosaic_0001>

<bundles_post_ra>
// kernel: tpu_custom_call.1
= control target key start
LH: loop header
LB: loop body
LE: loop exit
PB: predicated region body
PF: predicated region fallthrough
CT: control target
= control target key end

     0   :  { %s1747_s0 = inlined_call_operand.vmem [shape: f32[2,8,32], index: 0, kind: input, shape index: {}]   ;;  %s1748_s1 = inlined_call_operand.vmem [shape: bf16[32,32], index: 1, kind: input, shape index: {}]   ;;  %s1749_s2 = inlined_call_operand.vmem [shape: f32[1,32], index: 2, kind: input, shape index: {}]   ;;  %s1750_s3 = inlined_call_operand.vmem [shape: bf16[32,32], index: 3, kind: input, shape index: {}]   ;;  %s1751_s4 = inlined_call_operand.vmem [shape: f32[1,32], index: 4, kind: input, shape index: {}]   ;;  %s1752_s5 = inlined_call_operand.vmem [shape: bf16[32,32], index: 5, kind: input, shape index: {}]   ;;  %s1753_s6 = inlined_call_operand.vmem [shape: f32[1,32], index: 6, kind: input, shape index: {}]   ;;  %s1754_s7 = inlined_call_operand.vmem [shape: bf16[4,8,32], index: 7, kind: input, shape index: {}]   ;;  %s1755_s8 = inlined_call_operand.vmem [shape: f32[1,32], index: 8, kind: input, shape index: {}]   ;;  %s1756_s9 = inlined_call_operand.vmem [shape: f32[1,32], index: 9, kind: input, shape index: {}]   ;;  %s1757_s10 = inlined_call_operand.vmem [shape: f32[1,32], index: 10, kind: input, shape index: {}]   ;;  %s1758_s11 = inlined_call_operand.vmem [shape: f32[1,32], index: 11, kind: input, shape index: {}]   ;;  %s1759_s12 = inlined_call_operand.vmem [shape: f32[1,32], index: 12, kind: input, shape index: {}]   ;;  %s1760_s13 = inlined_call_operand.hbm [shape: bf16[32,128], index: 13, kind: input, shape index: {}]   ;;  %s1761_s14 = inlined_call_operand.vmem [shape: f32[1,128], index: 14, kind: input, shape index: {}]   ;;  %s1762_s15 = inlined_call_operand.vmem [shape: bf16[128,32], index: 15, kind: input, shape index: {}]   ;;  %s1763_s16 = inlined_call_operand.vmem [shape: f32[1,32], index: 16, kind: input, shape index: {}]   ;;  %s1764_s17 = inlined_call_operand.hbm [shape: f32[2,8,32], index: 17, kind: output, shape index: {}]  }
   0x1   :  { %1767 = sst [smem:[#allocation8_spill]] %s1747_s0 }
   0x2   :  { %1768 = sst [smem:[#allocation9_spill]] %s1748_s1 }
   0x3   :  { %22 = vsyncpa [#allocation3], 0 }
   0x4   :  { %23 = vsyncpa [#allocation4], 0  ;;  %s54_s26 = sshll.u32 %s1760_s13, 4  ;;  %s1363_s27 = smov [#allocation2]   ;;  %s55_s26 = int_to_ptr.hbm [resolvable:$true] %s54_s26 }
   0x5   :  { %s56_s28 = sshll.u32 %s1363_s27, 4  ;;  %s1364_s29 = smov 64   ;;  %s57_s28 = int_to_ptr.vmem [resolvable:$true] %s56_s28 }
   0x6   :  { %s1365_s0 = smov 4  }
   0x7   :  { %62 = dma.hbm_to_vmem [thread:$0]  %s55_s26, 256, %s57_s28, [#allocation3], %s1364_s29, %s1364_s29, %s1365_s0  }
   0x8   :  { %1359 = dma.done.wait [#allocation3], 256  }
   0x9   :  { %1360 = vsyncadd [#allocation3], 4294967040  ;;  %vm77_vm0 = vcmask 261120   ;;  %s1769_s19 = sld [smem:[#allocation8_spill]]  ;;  %v1366_v4 = vmov 32.0   ;;  %v1230_v22 = vld [vmem:[%s1752_s5 + $0x8] sm:$0xff] }
   0xa   :  { %1261 = vrcp.f32 %v1366_v4  ;;  %s1770_s22 = sld [smem:[#allocation9_spill]]  ;;  %243 = vmatpush.bf16.msra.mxu2 %v1230_v22  ;;  %v1229_v25 = vld [vmem:[%s1752_s5] sm:$0xff]  ;;  %v1228_v28 = vld [vmem:[%s1750_s3 + $0x8] sm:$0xff]  ;;  %vm274_vm8 = vcmask 64512   ;;  %vm402_vm9 = vcmask 1043456   ;;  %s1117_s20 = sshll.u32 %s1764_s17, 4  ;;  %s1118_s20 = int_to_ptr.hbm [resolvable:$true] %s1117_s20 }
   0xb   :  { %v1227_v31 = vld [vmem:[%s1750_s3] sm:$0xff] }
   0xc   :  { %v1251_v46 = vld [vmem:[%s1756_s9] ss:$0 sm:$0xff] }
   0xd   :  { %v1252_v51 = vld [vmem:[%s1757_s10] ss:$0 sm:$0xff] }
   0xe   :  { %244 = vmatpush.bf16.msra.mxu2 %v1229_v25  ;;  %v1253_v57 = vld [vmem:[%s1749_s2] ss:$0 sm:$0xff]  ;;  %s1367_s2 = smov 112  }
   0xf   :  { %v1469_v0 = vld [vmem:[%s1769_s19] sm:$0xff]  ;;  %v1476_v2 = vld [vmem:[%s1769_s19 + $0x8] sm:$0xff]  ;;  %s1370_s19 = smov [#allocation5]  }
  0x10   :  { %v78_v1 = vsel %vm77_vm0, %v1469_v0, 0.0  ;;  %v81_v3 = vsel %vm77_vm0, %v1476_v2, 0.0  ;;  %v1262_v5 = vpop.eup %1261  ;;  %v1226_v21 = vld [vmem:[%s1770_s22 + $0x8] sm:$0xff]  ;;  %v1225_v24 = vld [vmem:[%s1770_s22] sm:$0xff]  ;;  %s1115_s13 = sshll.u32 %s1370_s19, 4  ;;  %s1116_s13 = int_to_ptr.vmem [resolvable:$true] %s1115_s13 }
  0x11   :  { %79 = vadd.xlane.f32.xlu0 %v78_v1  ;;  %v85_v6 = vmul.f32 32.0, %v1262_v5  ;;  %vm89_vm1 = vweird.f32 %v1262_v5  ;;  %171 = vmatpush.bf16.msra.mxu1 %v1226_v21  ;;  %v1525_v60 = vld [vmem:[%s1753_s6] ss:$0 sm:$0xff]  ;;  %s1368_s6 = smov 120  }
  0x12   :  { %v1530_v62 = vld [vmem:[%s1751_s4] ss:$0 sm:$0xff]  ;;  %s1369_s4 = smov 104  }
  0x13   :  { %v86_v7 = vsub.f32 1.0, %v85_v6 }
  0x15   :  { %v87_v8 = vmul.f32 %v1262_v5, %v86_v7  ;;  %172 = vmatpush.bf16.msra.mxu1 %v1225_v24 }
  0x17   :  { %v88_v9 = vadd.f32 %v1262_v5, %v87_v8 }
  0x19   :  { %82 = vadd.xlane.f32.xlu0 %v81_v3  ;;  %v1480_v10 = vsel %vm89_vm1, %v1262_v5, %v88_v9  ;;  %207 = vmatpush.bf16.msrb.mxu1 %v1228_v28 }
  0x1d   :  { %208 = vmatpush.bf16.msrb.mxu1 %v1227_v31 }
  0x84   :  { %v80_v11 = vpop.xlane.xlu0 %79 }
  0x85   :  { %v91_v12 = vmul.f32 %v1480_v10, %v80_v11 }
  0x87   :  { %v93_v13 = vsub.f32 %v1469_v0, %v91_v12 }
  0x89   :  { %v95_v14 = vmul.f32 %v93_v13, %v93_v13 }
  0x8b   :  { %v97_v15 = vsel %vm77_vm0, %v95_v14, 0.0 }
  0x8c   :  { %98 = vadd.xlane.f32.xlu1 %v97_v15  ;;  %v83_v16 = vpop.xlane.xlu0 %82 }
  0x8d   :  { %v92_v17 = vmul.f32 %v1480_v10, %v83_v16 }
  0x8f   :  { %v94_v18 = vsub.f32 %v1476_v2, %v92_v17 }
  0x91   :  { %v96_v19 = vmul.f32 %v94_v18, %v94_v18 }
  0x93   :  { %v100_v20 = vsel %vm77_vm0, %v96_v19, 0.0 }
  0x94   :  { %101 = vadd.xlane.f32.xlu1 %v100_v20 }
  0xff   :  { %v99_v23 = vpop.xlane.xlu1 %98 }
 0x100   :  { %v103_v26 = vmul.f32 %v99_v23, %v1480_v10 }
 0x102   :  { %v105_v27 = vadd.f32 1e-05, %v103_v26 }
 0x104   :  { %1263 = vrsqrt.f32 %v105_v27  ;;  %vm113_vm3 = vweird.f32 %v105_v27 }
 0x107   :  { %v102_v29 = vpop.xlane.xlu1 %101 }
 0x108   :  { %v104_v30 = vmul.f32 %v102_v29, %v1480_v10 }
 0x10a   :  { %v1264_v32 = vpop.eup %1263  ;;  %v106_v33 = vadd.f32 1e-05, %v104_v30 }
 0x10b   :  { %v108_v34 = vmul.f32 %v1264_v32, %v105_v27  ;;  %vm114_vm2 = vweird.f32 %v1264_v32 }
 0x10c   :  { %1265 = vrsqrt.f32 %v106_v33  ;;  %vm115_vm4 = vmor %vm113_vm3, %vm114_vm2  ;;  %vm123_vm6 = vweird.f32 %v106_v33 }
 0x10d   :  { %v109_v35 = vmul.f32 %v1264_v32, %v108_v34 }
 0x10f   :  { %v110_v36 = vmul.f32 0.5, %v109_v35 }
 0x111   :  { %v111_v37 = vsub.f32 1.5, %v110_v36 }
 0x112   :  { %v1266_v38 = vpop.eup %1265 }
 0x113   :  { %v112_v39 = vmul.f32 %v1264_v32, %v111_v37  ;;  %v118_v40 = vmul.f32 %v1266_v38, %v106_v33  ;;  %vm124_vm5 = vweird.f32 %v1266_v38 }
 0x114   :  { %vm125_vm7 = vmor %vm123_vm6, %vm124_vm5 }
 0x115   :  { %v119_v41 = vmul.f32 %v1266_v38, %v118_v40  ;;  %v116_v42 = vsel %vm115_vm4, %v1264_v32, %v112_v39 }
 0x116   :  { %v127_v45 = vmul.f32 %v116_v42, %v93_v13  ;;  %v480_v42 = vld [vmem:[%s1754_s7] sm:$0xf] }
 0x117   :  { %v120_v43 = vmul.f32 0.5, %v119_v41 }
 0x118   :  { %v133_v50 = vmul.f32 %v1251_v46, %v127_v45 }
 0x119   :  { %v121_v44 = vsub.f32 1.5, %v120_v43  ;;  %v488_v43 = vsel %vm402_vm9, %v480_v42, 0 }
 0x11a   :  { %v139_v53 = vadd.f32 %v1252_v51, %v133_v50 }
 0x11b   :  { %v122_v47 = vmul.f32 %v1266_v38, %v121_v44 }
 0x11d   :  { %v126_v48 = vsel %vm125_vm7, %v1266_v38, %v122_v47 }
 0x11e   :  { %v128_v49 = vmul.f32 %v126_v48, %v94_v18 }
 0x120   :  { %v134_v52 = vmul.f32 %v1251_v46, %v128_v49 }
 0x122   :  { %v140_v54 = vadd.f32 %v1252_v51, %v134_v52 }
 0x124   :  { %v141_v55 = vpack.c.bf16 %v140_v54, %v139_v53 }
 0x126   :  { %1139 = vmatmul.msk.bf16.vlgmr.msra.gmra.mxu1 %vm77_vm0, %v141_v55  ;;  %1157 = vmatmul.msk.bf16.vlgmr.msra.gmra.mxu2 %vm77_vm0, %v141_v55 }
 0x136   :  { %1148 = vmatmul.msk.bf16.vlgmr.msrb.gmra.mxu1 %vm77_vm0, %v141_v55 }
 0x1a3   :  { %v174_v56 = vpop.f32.mrf.mxu1 }
 0x1a4   :  { %v175_v8 = vadd.f32 %v1253_v57, %v174_v56 }
 0x1a6   :  { %v179_v9 = vpack.c.bf16 %v175_v8, %v175_v8 }
 0x1a9   :  { %v246_v61 = vpop.f32.mrf.mxu2 }
 0x1aa   :  { %v247_v63 = vadd.f32 %v1525_v60, %v246_v61 }
 0x1ab   :  { %v176_v58 = vpop.f32.mrf.mxu1 }
 0x1ac   :  { %v1520_v59 = vadd.f32 %v1253_v57, %v176_v58  ;;  %v1534_v4 = vpack.c.bf16 %v247_v63, %v247_v63 }
 0x1ae   :  { %v404_v7 = vsel %vm402_vm9, %v1534_v4, 0  ;;  %v1566_v41 = vpack.c.bf16 %v1520_v59, %v1520_v59 }
 0x1b1   :  { %v1553_v23 = vpop.f32.mrf.mxu2 }
 0x1b3   :  { %v210_v1 = vpop.f32.mrf.mxu1 }
 0x1b4   :  { %v211_v3 = vadd.f32 %v1530_v62, %v210_v1 }
 0x1b6   :  { %v215_v5 = vpack.c.bf16 %v211_v3, %v211_v3 }
 0x1b8   :  { %263 = vrot.lane.b32.xlu1 %v215_v5, %s1367_s2  ;;  %261 = vrot.lane.b32.xlu0 %v215_v5, %s1368_s6  ;;  %v279_v6 = vsel %vm274_vm8, %v215_v5, 0 }
 0x1b9   :  { %265 = vrot.lane.b32.xlu2 %v215_v5, %s1369_s4  ;;  %288 = vmatpush.bf16.xpose.msra.mxu3 %v279_v6  ;;  %v483_v6 = vld [vmem:[%s1754_s7 + $0xc] sm:$0xf] }
 0x1bb   :  { %v212_v27 = vpop.f32.mrf.mxu1 }
 0x1bc   :  { %v213_v39 = vadd.f32 %v1530_v62, %v212_v27 }
 0x1be   :  { %v216_v40 = vpack.c.bf16 %v213_v39, %v213_v39 }
 0x1c0   :  { %1158 = vmatmul.msk.bf16.vlgmr.msra.gmra.mxu3 %vm274_vm8, %v179_v9  ;;  %v592_v5 = vsel %vm274_vm8, %v216_v40, 0 }
 0x1c1   :  { %413 = vmatpush.bf16.msrb.mxu3 %v404_v7  ;;  %258 = vrot.lane.b32.xlu2 %v179_v9, %s1369_s4  ;;  %v545_v7 = vsel %vm402_vm9, %v483_v6, 0 }
 0x1c5   :  { %497 = vmatpush.bf16.msra.mxu3 %v488_v43 }
 0x1c9   :  { %254 = vrot.lane.b32.xlu2 %v179_v9, %s1368_s6 }
 0x1d1   :  { %256 = vrot.lane.b32.xlu2 %v179_v9, %s1367_s2 }
 0x213   :  { %v266_v11 = vpop.permute.xlu2 %265 }
 0x214   :  { %v336_v12 = vsel %vm274_vm8, %v266_v11, 0 }
 0x215   :  { %345 = vmatpush.bf16.xpose.msrb.mxu2 %v336_v12 }
 0x21b   :  { %v259_v13 = vpop.permute.xlu2 %258 }
 0x21c   :  { %1161 = vmatmul.msk.bf16.vlgmr.msrb.gmra.mxu2 %vm274_vm8, %v259_v13  ;;  %v482_v13 = vld [vmem:[%s1754_s7 + $0x8] sm:$0xf] }
 0x223   :  { %v255_v14 = vpop.permute.xlu2 %254 }
 0x22a   :  { %v264_v15 = vpop.permute.xlu1 %263  ;;  %v262_v16 = vpop.permute.xlu0 %261 }
 0x22b   :  { %v317_v17 = vsel %vm274_vm8, %v264_v15, 0  ;;  %v298_v18 = vsel %vm274_vm8, %v262_v16, 0  ;;  %v257_v19 = vpop.permute.xlu2 %256 }
 0x22c   :  { %307 = vmatpush.bf16.xpose.msra.mxu0 %v298_v18  ;;  %326 = vmatpush.bf16.xpose.msra.mxu1 %v317_v17 }
 0x233   :  { %1159 = vmatmul.msk.bf16.vlgmr.msra.gmra.mxu0 %vm274_vm8, %v255_v14  ;;  %1160 = vmatmul.msk.bf16.vlgmr.msra.gmra.mxu1 %vm274_vm8, %v257_v19  ;;  %v481_v19 = vld [vmem:[%s1754_s7 + $0x4] sm:$0xf] }
 0x243   :  { %v290_v20 = vpop.f32.mrf.mxu3 }
 0x244   :  { %v351_v21 = vsel %vm274_vm8, %v290_v20, -inf }
 0x245   :  { %352 = vmax.xlane.f32.xlu2 %v351_v21 }
 0x24b   :  { %v292_v22 = vpop.f32.mrf.mxu3 }
 0x29f   :  { %v347_v24 = vpop.f32.mrf.mxu2 }
 0x2a0   :  { %v360_v25 = vsel %vm274_vm8, %v347_v24, -inf }
 0x2a1   :  { %361 = vmax.xlane.f32.xlu0 %v360_v25 }
 0x2a7   :  { %v349_v26 = vpop.f32.mrf.mxu2 }
 0x2b0   :  { %v309_v28 = vpop.f32.mrf.mxu0  ;;  %v328_v29 = vpop.f32.mrf.mxu1 }
 0x2b1   :  { %v354_v30 = vsel %vm274_vm8, %v309_v28, -inf  ;;  %v357_v31 = vsel %vm274_vm8, %v328_v29, -inf }
 0x2b2   :  { %355 = vmax.xlane.f32.xlu1 %v354_v30  ;;  %358 = vmax.xlane.f32.xlu2 %v357_v31 }
 0x2b8   :  { %v311_v32 = vpop.f32.mrf.mxu0  ;;  %v330_v33 = vpop.f32.mrf.mxu1 }
 0x2b9   :  { %v353_v34 = vpop.xlane.xlu2 %352 }
 0x2ba   :  { %v363_v35 = vsub.f32 %v290_v20, %v353_v34  ;;  %v526_v20 = vsel %vm402_vm9, %v482_v13, 0 }
 0x2bc   :  { %v367_v36 = vmul.f32 1.442695, %v363_v35  ;;  %v249_v35 = vadd.f32 %v1525_v60, %v1553_v23 }
 0x2be   :  { %1267 = vpow2.f32 %v367_v36  ;;  %v1611_v36 = vpack.c.bf16 %v249_v35, %v249_v35 }
 0x2c0   :  { %v716_v39 = vsel %vm402_vm9, %v1611_v36, 0 }
 0x2c4   :  { %v1268_v37 = vpop.eup %1267 }
 0x2c5   :  { %v375_v38 = vsel %vm274_vm8, %v1268_v37, 0.0 }
 0x2c6   :  { %376 = vadd.xlane.f32.xlu0 %v375_v38 }
 0x2cb   :  { %272 = vrot.lane.b32.xlu1 %v1534_v4, %s1369_s4 }
 0x2d3   :  { %579 = vrot.lane.b32.xlu1 %v216_v40, %s1369_s4 }
 0x2db   :  { %575 = vrot.lane.b32.xlu1 %v216_v40, %s1368_s6 }
 0x2e3   :  { %570 = vrot.lane.b32.xlu1 %v1566_v41, %s1367_s2 }
 0x314   :  { %v362_v46 = vpop.xlane.xlu0 %361 }
 0x315   :  { %v366_v51 = vsub.f32 %v347_v24, %v362_v46 }
 0x317   :  { %v373_v52 = vmul.f32 1.442695, %v366_v51 }
 0x325   :  { %v356_v44 = vpop.xlane.xlu1 %355  ;;  %v359_v45 = vpop.xlane.xlu2 %358 }
 0x326   :  { %v364_v47 = vsub.f32 %v309_v28, %v356_v44  ;;  %v365_v48 = vsub.f32 %v328_v29, %v359_v45  ;;  %v507_v28 = vsel %vm402_vm9, %v481_v19, 0 }
 0x328   :  { %v369_v49 = vmul.f32 1.442695, %v364_v47  ;;  %v371_v50 = vmul.f32 1.442695, %v365_v48 }
 0x32a   :  { %1269 = vpow2.f32 %v369_v49 }
 0x32b   :  { %1271 = vpow2.f32 %v371_v50 }
 0x32c   :  { %1273 = vpow2.f32 %v373_v52 }
 0x330   :  { %v1270_v53 = vpop.eup %1269 }
 0x331   :  { %v1272_v54 = vpop.eup %1271  ;;  %v378_v55 = vsel %vm274_vm8, %v1270_v53, 0.0 }
 0x332   :  { %379 = vadd.xlane.f32.xlu0 %v378_v55  ;;  %v381_v56 = vsel %vm274_vm8, %v1272_v54, 0.0  ;;  %v1274_v57 = vpop.eup %1273 }
 0x333   :  { %382 = vadd.xlane.f32.xlu2 %v381_v56  ;;  %v384_v59 = vsel %vm274_vm8, %v1274_v57, 0.0 }
 0x339   :  { %v377_v58 = vpop.xlane.xlu0 %376 }
 0x33a   :  { %1275 = vrcp.f32 %v377_v58 }
 0x33b   :  { %385 = vadd.xlane.f32.xlu2 %v384_v59 }
 0x33d   :  { %v273_v61 = vpop.permute.xlu1 %272 }
 0x33e   :  { %v461_v62 = vsel %vm402_vm9, %v273_v61, 0 }
 0x33f   :  { %470 = vmatpush.bf16.msra.mxu2 %v461_v62 }
 0x340   :  { %v1276_v63 = vpop.eup %1275 }
 0x341   :  { %v391_v1 = vmul.f32 %v1276_v63, %v1268_v37 }
 0x343   :  { %v395_v3 = vpack.c.bf16 %v391_v1, %v391_v1  ;;  %554 = vmatpush.bf16.msrb.mxu2 %v545_v7 }
 0x345   :  { %1162 = vmatmul.msk.bf16.vlgmr.msrb.gmra.mxu3 %vm274_vm8, %v395_v3  ;;  %v580_v12 = vpop.permute.xlu1 %579 }
 0x346   :  { %601 = vmatpush.bf16.xpose.msrb.mxu3 %v592_v5  ;;  %268 = vrot.lane.b32.xlu0 %v1534_v4, %s1368_s6  ;;  %v649_v29 = vsel %vm274_vm8, %v580_v12, 0 }
 0x34d   :  { %v576_v30 = vpop.permute.xlu1 %575 }
 0x34e   :  { %572 = vrot.lane.b32.xlu0 %v1566_v41, %s1369_s4  ;;  %v611_v32 = vsel %vm274_vm8, %v576_v30, 0 }
 0x353   :  { %270 = vrot.lane.b32.xlu2 %v1534_v4, %s1367_s2 }
 0x355   :  { %v571_v50 = vpop.permute.xlu1 %570 }
 0x356   :  { %568 = vrot.lane.b32.xlu0 %v1566_v41, %s1368_s6 }
 0x35b   :  { %577 = vrot.lane.b32.xlu2 %v216_v40, %s1367_s2 }
 0x3a5   :  { %v380_v9 = vpop.xlane.xlu0 %379 }
 0x3a6   :  { %v383_v8 = vpop.xlane.xlu2 %382 }
 0x3a7   :  { %1277 = vrcp.f32 %v383_v8 }
 0x3a8   :  { %1279 = vrcp.f32 %v380_v9 }
 0x3ad   :  { %v1278_v4 = vpop.eup %1277 }
 0x3ae   :  { %v386_v11 = vpop.xlane.xlu2 %385  ;;  %v1280_v14 = vpop.eup %1279  ;;  %v393_v16 = vmul.f32 %v1278_v4, %v1272_v54 }
 0x3af   :  { %1281 = vrcp.f32 %v386_v11  ;;  %v392_v21 = vmul.f32 %v1280_v14, %v1270_v53 }
 0x3b0   :  { %v397_v26 = vpack.c.bf16 %v393_v16, %v393_v16 }
 0x3b1   :  { %v396_v31 = vpack.c.bf16 %v392_v21, %v392_v21 }
 0x3b5   :  { %v1282_v15 = vpop.eup %1281 }
 0x3b6   :  { %v394_v17 = vmul.f32 %v1282_v15, %v1274_v57  ;;  %v271_v18 = vpop.permute.xlu2 %270 }
 0x3b7   :  { %v442_v22 = vsel %vm402_vm9, %v271_v18, 0 }
 0x3b8   :  { %v398_v24 = vpack.c.bf16 %v394_v17, %v394_v17  ;;  %451 = vmatpush.bf16.msrb.mxu1 %v442_v22  ;;  %v269_v25 = vpop.permute.xlu0 %268 }
 0x3b9   :  { %v423_v27 = vsel %vm402_vm9, %v269_v25, 0  ;;  %v1639_v25 = vld [vmem:[%s1755_s8] ss:$0 sm:$0xff] }
 0x3ba   :  { %1165 = vmatmul.msk.bf16.vlgmr.msra.gmra.mxu2 %vm274_vm8, %v398_v24  ;;  %432 = vmatpush.bf16.msrb.mxu0 %v423_v27 }
 0x3bb   :  { %658 = vmatpush.bf16.xpose.msra.mxu2 %v649_v29  ;;  %1164 = vmatmul.msk.bf16.vlgmr.msrb.gmra.mxu1 %vm274_vm8, %v397_v26 }
 0x3bc   :  { %535 = vmatpush.bf16.msra.mxu1 %v526_v20 }
 0x3bd   :  { %1163 = vmatmul.msk.bf16.vlgmr.msrb.gmra.mxu0 %vm274_vm8, %v396_v31 }
 0x3be   :  { %516 = vmatpush.bf16.msra.mxu0 %v507_v28  ;;  %v578_v33 = vpop.permute.xlu2 %577 }
 0x3bf   :  { %v630_v34 = vsel %vm274_vm8, %v578_v33, 0 }
 0x3c0   :  { %639 = vmatpush.bf16.xpose.msrb.mxu1 %v630_v34  ;;  %v573_v47 = vpop.permute.xlu0 %572 }
 0x3c2   :  { %620 = vmatpush.bf16.xpose.msrb.mxu0 %v611_v32 }
 0x3c8   :  { %v415_v37 = vpop.f32.mrf.mxu3 }
 0x3c9   :  { %v476_v38 = vpack.c.bf16 %v415_v37, %v415_v37 }
 0x3cb   :  { %1166 = vmatmul.msk.bf16.vlgmr.msra.gmra.mxu3 %vm274_vm8, %v476_v38 }
 0x3cc   :  { %725 = vmatpush.bf16.msra.mxu3 %v716_v39 }
 0x3d0   :  { %v417_v40 = vpop.f32.mrf.mxu3 }
 0x3db   :  { %1170 = vmatmul.msk.bf16.vlgmr.msrb.gmra.mxu3 %vm274_vm8, %v1566_v41  ;;  %v569_v41 = vpop.permute.xlu0 %568 }
 0x438   :  { %v453_v42 = vpop.f32.mrf.mxu1 }
 0x439   :  { %v478_v43 = vpack.c.bf16 %v453_v42, %v453_v42 }
 0x43a   :  { %v434_v44 = vpop.f32.mrf.mxu0 }
 0x43b   :  { %v477_v45 = vpack.c.bf16 %v434_v44, %v434_v44  ;;  %1168 = vmatmul.msk.bf16.vlgmr.msra.gmra.mxu1 %vm274_vm8, %v478_v43 }
 0x43d   :  { %v472_v60 = vpop.f32.mrf.mxu2  ;;  %1167 = vmatmul.msk.bf16.vlgmr.msra.gmra.mxu0 %vm274_vm8, %v477_v45 }
 0x43e   :  { %v479_v23 = vpack.c.bf16 %v472_v60, %v472_v60 }
 0x440   :  { %v455_v46 = vpop.f32.mrf.mxu1  ;;  %1169 = vmatmul.msk.bf16.vlgmr.msrb.gmra.mxu2 %vm274_vm8, %v479_v23 }
 0x442   :  { %v436_v48 = vpop.f32.mrf.mxu0 }
 0x445   :  { %v474_v49 = vpop.f32.mrf.mxu2 }
 0x44b   :  { %1172 = vmatmul.msk.bf16.vlgmr.msrb.gmra.mxu1 %vm274_vm8, %v571_v50 }
 0x44d   :  { %1171 = vmatmul.msk.bf16.vlgmr.msrb.gmra.mxu0 %vm274_vm8, %v569_v41 }
 0x44e   :  { %v499_v51 = vpop.f32.mrf.mxu3 }
 0x44f   :  { %v560_v58 = vsel %vm77_vm0, %v499_v51, 0.0 }
 0x450   :  { %1173 = vmatmul.msk.bf16.vlgmr.msra.gmra.mxu2 %vm274_vm8, %v573_v47 }
 0x456   :  { %v501_v52 = vpop.f32.mrf.mxu3 }
 0x45e   :  { %v603_v53 = vpop.f32.mrf.mxu3 }
 0x45f   :  { %v664_v54 = vsel %vm274_vm8, %v603_v53, -inf }
 0x460   :  { %665 = vmax.xlane.f32.xlu2 %v664_v54 }
 0x466   :  { %v605_v55 = vpop.f32.mrf.mxu3 }
 0x4b8   :  { %v537_v56 = vpop.f32.mrf.mxu1 }
 0x4b9   :  { %v563_v62 = vsel %vm77_vm0, %v537_v56, 0.0 }
 0x4ba   :  { %v518_v57 = vpop.f32.mrf.mxu0 }
 0x4bb   :  { %v561_v59 = vsel %vm77_vm0, %v518_v57, 0.0 }
 0x4bc   :  { %v562_v61 = vadd.f32 %v561_v59, %v560_v58 }
 0x4be   :  { %v564_v63 = vadd.f32 %v563_v62, %v562_v61 }
 0x4c0   :  { %v539_v1 = vpop.f32.mrf.mxu1 }
 0x4c2   :  { %v520_v3 = vpop.f32.mrf.mxu0 }
 0x4c3   :  { %v556_v5 = vpop.f32.mrf.mxu2 }
 0x4c4   :  { %v565_v21 = vsel %vm77_vm0, %v556_v5, 0.0 }
 0x4c5   :  { %v566_v22 = vadd.f32 %v565_v21, %v564_v63 }
 0x4c7   :  { %v879_v24 = vadd.f32 %v566_v22, %v1469_v0 }
 0x4c8   :  { %v641_v6 = vpop.f32.mrf.mxu1 }
 0x4c9   :  { %v670_v7 = vsel %vm274_vm8, %v641_v6, -inf  ;;  %v1642_v26 = vadd.f32 %v1639_v25, %v879_v24 }
 0x4ca   :  { %671 = vmax.xlane.f32.xlu2 %v670_v7  ;;  %v622_v8 = vpop.f32.mrf.mxu0 }
 0x4cb   :  { %v558_v9 = vpop.f32.mrf.mxu2  ;;  %v667_v11 = vsel %vm274_vm8, %v622_v8, -inf  ;;  %v887_v27 = vsel %vm77_vm0, %v1642_v26, 0.0 }
 0x4cc   :  { %668 = vmax.xlane.f32.xlu1 %v667_v11 }
 0x4d0   :  { %v643_v12 = vpop.f32.mrf.mxu1 }
 0x4d2   :  { %v624_v4 = vpop.f32.mrf.mxu0 }
 0x4d3   :  { %v660_v13 = vpop.f32.mrf.mxu2  ;;  %v666_v14 = vpop.xlane.xlu2 %665  ;;  %v793_v4 = vld [vmem:[%s1754_s7 + $0x4] sm:$0xf] }
 0x4d4   :  { %v676_v15 = vsub.f32 %v603_v53, %v666_v14  ;;  %v673_v16 = vsel %vm274_vm8, %v660_v13, -inf  ;;  %v792_v53 = vld [vmem:[%s1754_s7] sm:$0xf]  ;;  %v795_v14 = vld [vmem:[%s1754_s7 + $0xc] sm:$0xf] }
 0x4d5   :  { %674 = vmax.xlane.f32.xlu0 %v673_v16  ;;  %v800_v54 = vsel %vm402_vm9, %v792_v53, 0  ;;  %v794_v16 = vld [vmem:[%s1754_s7 + $0x8] sm:$0xf]  ;;  %s1372_s7 = smov 8  }
 0x4d6   :  { %v680_v17 = vmul.f32 1.442695, %v676_v15  ;;  %809 = vmatpush.bf16.msrb.mxu3 %v800_v54  ;;  %v857_v15 = vsel %vm402_vm9, %v795_v14, 0 }
 0x4d8   :  { %1283 = vpow2.f32 %v680_v17  ;;  %v838_v17 = vsel %vm402_vm9, %v794_v16, 0 }
 0x4db   :  { %v662_v18 = vpop.f32.mrf.mxu2 }
 0x4de   :  { %v1284_v19 = vpop.eup %1283 }
 0x4df   :  { %v688_v20 = vsel %vm274_vm8, %v1284_v19, 0.0 }
 0x4e0   :  { %689 = vadd.xlane.f32.xlu0 %v688_v20 }
 0x4e2   :  { %586 = vrot.lane.b32.xlu2 %v1611_v36, %s1369_s4 }
 0x50b   :  { %888 = vadd.xlane.f32.xlu2 %v887_v27 }
 0x53d   :  { %v672_v28 = vpop.xlane.xlu2 %671 }
 0x53e   :  { %v678_v29 = vsub.f32 %v641_v6, %v672_v28 }
 0x53f   :  { %v669_v30 = vpop.xlane.xlu1 %668 }
 0x540   :  { %v684_v31 = vmul.f32 1.442695, %v678_v29  ;;  %v677_v32 = vsub.f32 %v622_v8, %v669_v30 }
 0x542   :  { %1285 = vpow2.f32 %v684_v31  ;;  %v682_v33 = vmul.f32 1.442695, %v677_v32 }
 0x544   :  { %1287 = vpow2.f32 %v682_v33 }
 0x545   :  { %v587_v0 = vpop.permute.xlu2 %586 }
 0x546   :  { %v773_v34 = vsel %vm402_vm9, %v587_v0, 0 }
 0x547   :  { %782 = vmatpush.bf16.msrb.mxu2 %v773_v34 }
 0x548   :  { %v1286_v35 = vpop.eup %1285  ;;  %v675_v37 = vpop.xlane.xlu0 %674 }
 0x549   :  { %v679_v38 = vsub.f32 %v660_v13, %v675_v37  ;;  %v694_v39 = vsel %vm274_vm8, %v1286_v35, 0.0  ;;  %v819_v13 = vsel %vm402_vm9, %v793_v4, 0  ;;  %v1258_v4 = vld [vmem:[%s1759_s12] ss:$0 sm:$0xff] }
 0x54a   :  { %v1288_v40 = vpop.eup %1287  ;;  %695 = vadd.xlane.f32.xlu1 %v694_v39 }
 0x54b   :  { %v686_v42 = vmul.f32 1.442695, %v679_v38  ;;  %v691_v43 = vsel %vm274_vm8, %v1288_v40, 0.0  ;;  %866 = vmatpush.bf16.msra.mxu2 %v857_v15 }
 0x54c   :  { %692 = vadd.xlane.f32.xlu0 %v691_v43 }
 0x54d   :  { %1289 = vpow2.f32 %v686_v42 }
 0x553   :  { %v1290_v44 = vpop.eup %1289  ;;  %v690_v45 = vpop.xlane.xlu0 %689 }
 0x554   :  { %1291 = vrcp.f32 %v690_v45  ;;  %v697_v60 = vsel %vm274_vm8, %v1290_v44, 0.0 }
 0x555   :  { %698 = vadd.xlane.f32.xlu1 %v697_v60 }
 0x55a   :  { %v1292_v23 = vpop.eup %1291 }
 0x55b   :  { %v704_v46 = vmul.f32 %v1292_v23, %v1284_v19 }
 0x55d   :  { %v708_v47 = vpack.c.bf16 %v704_v46, %v704_v46 }
 0x55f   :  { %1174 = vmatmul.msk.bf16.vlgmr.msra.gmra.mxu3 %vm274_vm8, %v708_v47 }
 0x560   :  { %582 = vrot.lane.b32.xlu0 %v1611_v36, %s1368_s6 }
 0x56e   :  { %584 = vrot.lane.b32.xlu1 %v1611_v36, %s1367_s2 }
 0x57e   :  { %v889_v48 = vpop.xlane.xlu2 %888 }
 0x57f   :  { %v893_v49 = vmul.f32 %v889_v48, %v1480_v10 }
 0x581   :  { %v1657_v50 = vsub.f32 %v1642_v26, %v893_v49 }
 0x583   :  { %v897_v41 = vmul.f32 %v1657_v50, %v1657_v50 }
 0x585   :  { %v899_v51 = vsel %vm77_vm0, %v897_v41, 0.0 }
 0x598   :  { %900 = vadd.xlane.f32.xlu1 %v899_v51 }
 0x5bd   :  { %v696_v52 = vpop.xlane.xlu1 %695 }
 0x5bf   :  { %v693_v36 = vpop.xlane.xlu0 %692 }
 0x5c0   :  { %1293 = vrcp.f32 %v693_v36  ;;  %v1231_v36 = vld [vmem:[#allocation2] sm:$0xff] }
 0x5c6   :  { %v1294_v56 = vpop.eup %1293 }
 0x5c7   :  { %v705_v59 = vmul.f32 %v1294_v56, %v1288_v40 }
 0x5c8   :  { %v699_v55 = vpop.xlane.xlu1 %698 }
 0x5c9   :  { %1295 = vrcp.f32 %v699_v55  ;;  %v709_v1 = vpack.c.bf16 %v705_v59, %v705_v59 }
 0x5ca   :  { %1297 = vrcp.f32 %v696_v52 }
 0x5cf   :  { %v1296_v57 = vpop.eup %1295 }
 0x5d0   :  { %v707_v58 = vmul.f32 %v1296_v57, %v1290_v44  ;;  %v1298_v3 = vpop.eup %1297 }
 0x5d1   :  { %v706_v5 = vmul.f32 %v1298_v3, %v1286_v35 }
 0x5d2   :  { %v711_v61 = vpack.c.bf16 %v707_v58, %v707_v58  ;;  %v583_v62 = vpop.permute.xlu0 %582 }
 0x5d3   :  { %v735_v63 = vsel %vm402_vm9, %v583_v62, 0  ;;  %v710_v9 = vpack.c.bf16 %v706_v5, %v706_v5 }
 0x5d4   :  { %1177 = vmatmul.msk.bf16.vlgmr.msrb.gmra.mxu2 %vm274_vm8, %v711_v61  ;;  %744 = vmatpush.bf16.msra.mxu0 %v735_v63 }
 0x5d7   :  { %1175 = vmatmul.msk.bf16.vlgmr.msra.gmra.mxu0 %vm274_vm8, %v709_v1 }
 0x5d8   :  { %828 = vmatpush.bf16.msrb.mxu0 %v819_v13 }
 0x5e0   :  { %v585_v6 = vpop.permute.xlu1 %584 }
 0x5e1   :  { %v754_v7 = vsel %vm402_vm9, %v585_v6, 0 }
 0x5e2   :  { %v727_v8 = vpop.f32.mrf.mxu3  ;;  %763 = vmatpush.bf16.msra.mxu1 %v754_v7 }
 0x5e3   :  { %v788_v11 = vpack.c.bf16 %v727_v8, %v727_v8 }
 0x5e5   :  { %1176 = vmatmul.msk.bf16.vlgmr.msra.gmra.mxu1 %vm274_vm8, %v710_v9  ;;  %1178 = vmatmul.msk.bf16.vlgmr.msrb.gmra.mxu3 %vm274_vm8, %v788_v11  ;;  %v1257_v9 = vld [vmem:[%s1758_s11] ss:$0 sm:$0xff] }
 0x5e6   :  { %847 = vmatpush.bf16.msrb.mxu1 %v838_v17 }
 0x5ea   :  { %v729_v12 = vpop.f32.mrf.mxu3 }
 0x60b   :  { %v901_v52 = vpop.xlane.xlu1 %900 }
 0x654   :  { %v746_v18 = vpop.f32.mrf.mxu0 }
 0x655   :  { %v789_v19 = vpack.c.bf16 %v746_v18, %v746_v18 }
 0x657   :  { %v784_v20 = vpop.f32.mrf.mxu2  ;;  %1179 = vmatmul.msk.bf16.vlgmr.msrb.gmra.mxu0 %vm274_vm8, %v789_v19  ;;  %v1239_v19 = vld [vmem:[%s1762_s15 + $0x30] sm:$0xff] }
 0x658   :  { %v791_v21 = vpack.c.bf16 %v784_v20, %v784_v20  ;;  %v1238_v20 = vld [vmem:[%s1762_s15 + $0x28] sm:$0xff] }
 0x65a   :  { %1181 = vmatmul.msk.bf16.vlgmr.msra.gmra.mxu2 %vm274_vm8, %v791_v21  ;;  %v1237_v21 = vld [vmem:[%s1762_s15 + $0x20] sm:$0xff] }
 0x65c   :  { %v748_v22 = vpop.f32.mrf.mxu0 }
 0x65d   :  { %v1259_v22 = vld [vmem:[%s1761_s14] ss:$0 sm:$0xff] }
 0x65f   :  { %v786_v24 = vpop.f32.mrf.mxu2 }
 0x660   :  { %v1236_v24 = vld [vmem:[%s1762_s15 + $0x18] sm:$0xff] }
 0x662   :  { %v765_v27 = vpop.f32.mrf.mxu1 }
 0x663   :  { %v790_v28 = vpack.c.bf16 %v765_v27, %v765_v27 }
 0x665   :  { %1180 = vmatmul.msk.bf16.vlgmr.msrb.gmra.mxu1 %vm274_vm8, %v790_v28 }
 0x668   :  { %v811_v29 = vpop.f32.mrf.mxu3 }
 0x669   :  { %v872_v35 = vsel %vm77_vm0, %v811_v29, 0.0  ;;  %v1235_v29 = vld [vmem:[%s1762_s15 + $0x10] sm:$0xff] }
 0x66a   :  { %v767_v30 = vpop.f32.mrf.mxu1 }
 0x670   :  { %v813_v31 = vpop.f32.mrf.mxu3 }
 0x6d4   :  { %v830_v32 = vpop.f32.mrf.mxu0 }
 0x6d5   :  { %v873_v34 = vsel %vm77_vm0, %v830_v32, 0.0  ;;  %v1234_v32 = vld [vmem:[%s1762_s15 + $0x8] sm:$0xff] }
 0x6d6   :  { %v874_v37 = vadd.f32 %v873_v34, %v872_v35  ;;  %v1233_v34 = vld [vmem:[%s1762_s15] sm:$0xff] }
 0x6dc   :  { %v832_v33 = vpop.f32.mrf.mxu0 }
 0x6dd   :  { %v868_v0 = vpop.f32.mrf.mxu2 }
 0x6de   :  { %v877_v42 = vsel %vm77_vm0, %v868_v0, 0.0 }
 0x6e2   :  { %v849_v38 = vpop.f32.mrf.mxu1 }
 0x6e3   :  { %v875_v39 = vsel %vm77_vm0, %v849_v38, 0.0 }
 0x6e4   :  { %v876_v40 = vadd.f32 %v875_v39, %v874_v37 }
 0x6e5   :  { %v870_v43 = vpop.f32.mrf.mxu2 }
 0x6e6   :  { %v878_v44 = vadd.f32 %v877_v42, %v876_v40 }
 0x6e8   :  { %v880_v45 = vadd.f32 %v1476_v2, %v878_v44  ;;  %v905_v2 = vmul.f32 %v901_v52, %v1480_v10 }
 0x6ea   :  { %v851_v60 = vpop.f32.mrf.mxu1  ;;  %v1693_v23 = vadd.f32 %v1639_v25, %v880_v45  ;;  %v907_v53 = vadd.f32 1e-05, %v905_v2  ;;  %v1232_v25 = vld [vmem:[#allocation2 + $0x8] sm:$0xff] }
 0x6eb   :  { %973 = vmatpush.bf16.msra.mxu3 %v1232_v25 }
 0x6ec   :  { %v890_v46 = vsel %vm77_vm0, %v1693_v23, 0.0  ;;  %1299 = vrsqrt.f32 %v907_v53  ;;  %vm915_vm11 = vweird.f32 %v907_v53 }
 0x6ed   :  { %891 = vadd.xlane.f32.xlu0 %v890_v46 }
 0x6ef   :  { %974 = vmatpush.bf16.msra.mxu3 %v1231_v36 }
 0x6f2   :  { %v1300_v54 = vpop.eup %1299 }
 0x6f3   :  { %v910_v55 = vmul.f32 %v1300_v54, %v907_v53  ;;  %vm916_vm10 = vweird.f32 %v1300_v54 }
 0x6f4   :  { %vm917_vm12 = vmor %vm915_vm11, %vm916_vm10 }
 0x6f5   :  { %v911_v56 = vmul.f32 %v1300_v54, %v910_v55 }
 0x6f7   :  { %v912_v61 = vmul.f32 0.5, %v911_v56 }
 0x6f9   :  { %v913_v62 = vsub.f32 1.5, %v912_v61 }
 0x6fb   :  { %v914_v1 = vmul.f32 %v1300_v54, %v913_v62 }
 0x6fd   :  { %v918_v6 = vsel %vm917_vm12, %v1300_v54, %v914_v1 }
 0x760   :  { %v892_v47 = vpop.xlane.xlu0 %891 }
 0x761   :  { %v894_v48 = vmul.f32 %v892_v47, %v1480_v10 }
 0x763   :  { %v896_v49 = vsub.f32 %v1693_v23, %v894_v48 }
 0x765   :  { %v898_v41 = vmul.f32 %v896_v49, %v896_v49 }
 0x767   :  { %v902_v51 = vsel %vm77_vm0, %v898_v41, 0.0 }
 0x768   :  { %903 = vadd.xlane.f32.xlu2 %v902_v51 }
 0x7db   :  { %v904_v57 = vpop.xlane.xlu2 %903 }
 0x7dc   :  { %v906_v58 = vmul.f32 %v904_v57, %v1480_v10  ;;  %v929_v10 = vmul.f32 %v918_v6, %v1657_v50  ;;  %v1240_v50 = vld [vmem:[%s1762_s15 + $0x38] sm:$0xff] }
 0x7dd   :  { %1092 = vmatpush.bf16.msra.mxu0 %v1240_v50 }
 0x7de   :  { %v908_v59 = vadd.f32 1e-05, %v906_v58  ;;  %v935_v13 = vmul.f32 %v1257_v9, %v929_v10 }
 0x7e0   :  { %1301 = vrsqrt.f32 %v908_v59  ;;  %vm925_vm14 = vweird.f32 %v908_v59  ;;  %v941_v16 = vadd.f32 %v1258_v4, %v935_v13 }
 0x7e1   :  { %1093 = vmatpush.bf16.msra.mxu0 %v1239_v19 }
 0x7e5   :  { %1094 = vmatpush.bf16.msra.mxu0 %v1238_v20 }
 0x7e6   :  { %v1302_v63 = vpop.eup %1301 }
 0x7e7   :  { %v920_v3 = vmul.f32 %v1302_v63, %v908_v59  ;;  %vm926_vm13 = vweird.f32 %v1302_v63 }
 0x7e8   :  { %vm927_vm15 = vmor %vm925_vm14, %vm926_vm13 }
 0x7e9   :  { %v921_v5 = vmul.f32 %v1302_v63, %v920_v3  ;;  %1095 = vmatpush.bf16.msra.mxu0 %v1237_v21 }
 0x7eb   :  { %v922_v7 = vmul.f32 0.5, %v921_v5 }
 0x7ed   :  { %v923_v8 = vsub.f32 1.5, %v922_v7  ;;  %1096 = vmatpush.bf16.msra.mxu0 %v1236_v24 }
 0x7ef   :  { %v924_v11 = vmul.f32 %v1302_v63, %v923_v8 }
 0x7f1   :  { %v928_v12 = vsel %vm927_vm15, %v1302_v63, %v924_v11  ;;  %1097 = vmatpush.bf16.msra.mxu0 %v1235_v29  ;;  %v1260_v63 = vld [vmem:[%s1763_s16] ss:$0 sm:$0xff]  ;;  %s1371_s16 = smov 128  }
 0x7f2   :  { %v930_v14 = vmul.f32 %v928_v12, %v896_v49 }
 0x7f4   :  { %v936_v15 = vmul.f32 %v1257_v9, %v930_v14 }
 0x7f5   :  { %1098 = vmatpush.bf16.msra.mxu0 %v1234_v32 }
 0x7f6   :  { %v942_v17 = vadd.f32 %v1258_v4, %v936_v15 }
 0x7f8   :  { %v943_v18 = vpack.c.bf16 %v942_v17, %v941_v16 }
 0x7f9   :  { %1099 = vmatpush.bf16.msra.mxu0 %v1233_v34 }
 0x7fa   :  { %1190 = vmatmul.msk.bf16.vlgmr.msra.gmra.mxu3 %vm77_vm0, %v943_v18 }
 0x87d   :  { %v976_v27 = vpop.f32.mrf.mxu3 }
 0x87e   :  { %v977_v28 = vadd.f32 %v1259_v22, %v976_v27 }
 0x880   :  { %v1191_v30 = vmul.f32 -1.702, %v977_v28 }
 0x882   :  { %v985_v31 = vmul.f32 1.442695, %v1191_v30 }
 0x884   :  { %1303 = vpow2.f32 %v985_v31 }
 0x885   :  { %v978_v33 = vpop.f32.mrf.mxu3 }
 0x886   :  { %v979_v0 = vadd.f32 %v1259_v22, %v978_v33 }
 0x888   :  { %v1192_v35 = vmul.f32 -1.702, %v979_v0 }
 0x88a   :  { %v1304_v37 = vpop.eup %1303  ;;  %v987_v38 = vmul.f32 1.442695, %v1192_v35 }
 0x88b   :  { %v989_v39 = vadd.f32 1.0, %v1304_v37 }
 0x88c   :  { %1305 = vpow2.f32 %v987_v38 }
 0x88d   :  { %1307 = vrcp.f32 %v989_v39  ;;  %v1002_v49 = vand.u32 2147483648, %v989_v39  ;;  %vm996_vm2 = vweird.f32 %v989_v39  ;;  %v1000_v41 = vand.u32 2147483647, %v989_v39 }
 0x88f   :  { %v1003_v54 = vor.u32 1.1754944e-38, %v1002_v49  ;;  %vm1001_vm5 = vcmp.eq.f32.partialorder %v1000_v41, 8.507059e+37 }
 0x892   :  { %v1306_v40 = vpop.eup %1305 }
 0x893   :  { %v1308_v42 = vpop.eup %1307  ;;  %v990_v43 = vadd.f32 1.0, %v1306_v40 }
 0x894   :  { %v992_v44 = vmul.f32 %v1308_v42, %v989_v39  ;;  %vm997_vm1 = vweird.f32 %v1308_v42 }
 0x895   :  { %1309 = vrcp.f32 %v990_v43  ;;  %vm998_vm3 = vmor %vm996_vm2, %vm997_vm1  ;;  %v1017_v52 = vand.u32 2147483648, %v990_v43  ;;  %v1015_v25 = vand.u32 2147483647, %v990_v43  ;;  %vm1011_vm6 = vweird.f32 %v990_v43 }
 0x896   :  { %v993_v45 = vsub.f32 1.0, %v992_v44 }
 0x897   :  { %v1018_v56 = vor.u32 1.1754944e-38, %v1017_v52  ;;  %vm1016_vm8 = vcmp.eq.f32.partialorder %v1015_v25, 8.507059e+37 }
 0x898   :  { %v994_v60 = vmul.f32 %v1308_v42, %v993_v45 }
 0x89a   :  { %v995_v47 = vadd.f32 %v1308_v42, %v994_v60 }
 0x89b   :  { %v1310_v46 = vpop.eup %1309 }
 0x89c   :  { %v1007_v48 = vmul.f32 %v1310_v46, %v990_v43  ;;  %v999_v2 = vsel %vm998_vm3, %v1308_v42, %v995_v47  ;;  %vm1012_vm4 = vweird.f32 %v1310_v46 }
 0x89d   :  { %v1004_v55 = vsel %vm1001_vm5, %v1003_v54, %v999_v2  ;;  %vm1013_vm7 = vmor %vm1011_vm6, %vm1012_vm4 }
 0x89e   :  { %v1008_v51 = vsub.f32 1.0, %v1007_v48  ;;  %v1021_v59 = vmul.f32 %v1004_v55, %v977_v28 }
 0x8a0   :  { %v1009_v53 = vmul.f32 %v1310_v46, %v1008_v51 }
 0x8a2   :  { %v1010_v36 = vadd.f32 %v1310_v46, %v1009_v53 }
 0x8a4   :  { %v1014_v57 = vsel %vm1013_vm7, %v1310_v46, %v1010_v36 }
 0x8a5   :  { %v1019_v58 = vsel %vm1016_vm8, %v1018_v56, %v1014_v57 }
 0x8a6   :  { %v1022_v61 = vmul.f32 %v1019_v58, %v979_v0 }
 0x8a8   :  { %v1023_v62 = vpack.c.bf16 %v1022_v61, %v1021_v59 }
 0x8aa   :  { %1100 = vmatmul.bf16.vlgmr.msra.gmra.mxu0 %v1023_v62 }
 0x927   :  { %v1101_v1 = vpop.f32.mrf.mxu0 }
 0x928   :  { %v1102_v3 = vadd.f32 %v1260_v63, %v1101_v1 }
 0x92a   :  { %v1106_v5 = vadd.f32 %v1102_v3, %v1642_v26 }
 0x92c   :  { %1108 = vst.msk [vmem:[#allocation5] sm:$0xff] %vm77_vm0, %v1106_v5 }
 0x92f   :  { %v1103_v6 = vpop.f32.mrf.mxu0 }
 0x930   :  { %v1104_v7 = vadd.f32 %v1260_v63, %v1103_v6 }
 0x932   :  { %v1107_v8 = vadd.f32 %v1104_v7, %v1693_v23 }
 0x934   :  { %1110 = vst.msk [vmem:[#allocation5 + $0x8] sm:$0xff] %vm77_vm0, %v1107_v8 }
 0x935   :  { %1123 = dma.vmem_to_hbm [thread:$0]  %s1116_s13, 256, %s1118_s20, [#allocation4], %s1371_s16, %s1371_s16, %s1372_s7  }
 0x936   :  { %1361 = dma.done.wait [#allocation4], 256  }
 0x937   :  { %1362 = vsyncadd [#allocation4], 4294967040 }
 0x938   :  { %1128 = vsyncpa [#allocation3], 1 }
 0x939   :  { %1129 = vsyncpa [#allocation4], 1 }

</bundles_post_ra>
